<compile_context>
chip_gen: v7x
topology: tpu7x:2x2x1
jax: 0.10.0
libtpu: 0.0.40
codegen_flags: <defaults>
</compile_context>

<pallas_src>
import functools
import math

import jax
import jax.numpy as jnp
from jax import lax
from jax.experimental import pallas as pl
from jax.experimental.pallas import tpu as pltpu


# lane index of each packed per-channel constant inside the (N_pad, 8) slab
_C_BIAS, _C_A, _C_B, _C_C, _C_GX, _C_GY = 0, 1, 2, 3, 4, 5


def _detect_level_kernel(nx, x_ref, w_ref, c_ref, raw_ref, y_ref):
    """One (batch, spatial-tile) grid step.

    x_ref  : (Cin,   TILE_S) f32   activations, NCHW-native (channels on sublanes)
    w_ref  : (N_pad, Cin)    f32   1x1-conv weight (zero-padded rows), resident
    c_ref  : (N_pad, 8)      f32   packed per-output-channel decode constants
    raw_ref: (N_pad, TILE_S) bf16  pre-sigmoid logits (torch x[i], channel-planar)
    y_ref  : (N_pad, TILE_S) f32   decoded predictions (channel-planar)
    """
    tile_s = y_ref.shape[-1]

    # 1x1 conv == (N_pad,Cin)@(Cin,TILE_S) matmul, f32 accumulate.  FLOPs are
    # negligible (kernel is HBM-bound on every generation), so no bf16 feed.
    logits = jnp.dot(w_ref[...], x_ref[...], preferred_element_type=jnp.float32)
    logits = logits + c_ref[:, _C_BIAS:_C_BIAS + 1]
    raw_ref[...] = logits.astype(raw_ref.dtype)      # bf16 store: halves raw writes

    # Sigmoid rides the EUP (tanh/exp path).  If a bundle dump ever shows a VPU
    # divide here, swap for pl.reciprocal(1 + exp(-logits), approx=True).
    y = jax.nn.sigmoid(logits)

    # Spatial coordinates of every lane of this tile, generated in-kernel.
    # Float multiply-by-reciprocal instead of int div/mod (no VPU integer-divide
    # sequence); the +0.5 keeps floor() robust against the inexact f32 1/nx.
    col = pl.program_id(1) * tile_s + lax.broadcasted_iota(jnp.int32, (1, tile_s), 1)
    colf = col.astype(jnp.float32)
    gy = jnp.floor((colf + 0.5) * (1.0 / nx))
    gx = colf - gy * float(nx)

    # Fused decode: xy -> (2s)*y - 0.5s + s*g, wh -> 4*anchor*y^2, rest -> y.
    ka = c_ref[:, _C_A:_C_A + 1]
    kb = c_ref[:, _C_B:_C_B + 1]
    kc = c_ref[:, _C_C:_C_C + 1]
    kgx = c_ref[:, _C_GX:_C_GX + 1]
    kgy = c_ref[:, _C_GY:_C_GY + 1]
    y_ref[...] = ka * y + kb * (y * y) + kc + kgx * gx + kgy * gy


def _pick_spatial_tile(s, bytes_per_lane, max_tile=2048,
                       vmem_budget=20 * 1024 * 1024):
    """Lane-tile for the merged ny*nx axis.

    Tiles are multiples of 128 (lane-dense stores); the largest one whose
    double-buffered in+out tiles stay under `vmem_budget` (safe for the 32 MiB
    scoped-VMEM limit on v5e/v6e/v7x).  Any level with s >= 256 gets at least
    2 spatial grid steps (both v7x TensorCores busy even at bs=1).  Ragged
    levels use a padded trailing block (OOB lanes are discarded by Pallas).
    """
    if s < 256:
        return s                                        # tiny level: one full block
    cap = min(max_tile, vmem_budget // (2 * bytes_per_lane))
    cap = max(128, (cap // 128) * 128)
    min_blocks = 2
    if s % 128 == 0:
        # Largest multiple of 128 <= cap dividing s, with >= min_blocks blocks.
        upper = max(128, min(cap, (s // min_blocks) // 128 * 128))
        best = 128
        for t in range(128, upper + 1, 128):
            if s % t == 0:
                best = t
        return best
    # Ragged s: even split, rounded up to a multiple of 128; trailing block is
    # partially out-of-bounds and handled by Pallas block padding.
    nb = max(min_blocks, math.ceil(s / cap))
    return math.ceil(math.ceil(s / nb) / 128) * 128


def detect_level(x_nchw, w_oi, bias, anchors_level, stride, no):
    """One detection level.

    x_nchw        : (bs, Cin, ny, nx) float32
    w_oi          : (N, Cin)  conv weight (1x1 kernel squeezed), N = na*no
    bias          : (N,)
    anchors_level : (na, 2)
    stride        : python float
    Returns (x_out, z):
      x_out : (bs, na, ny, nx, no)  raw logits (torch x[i])
      z     : (bs, na*ny*nx, no)    decoded predictions
    """
    bs, cin, ny, nx = x_nchw.shape
    na = anchors_level.shape[0]
    n = na * no
    n_pad = ((n + 7) // 8) * 8                      # sublane-align output channels
    s = ny * nx
    stride = float(stride)

    # VMEM bytes per lane of a double-buffered grid step:
    #   f32 activations in + bf16 raw out + f32 decode out.
    bytes_per_lane = cin * 4 + n_pad * (2 + 4)
    tile_s = _pick_spatial_tile(s, bytes_per_lane)
    ns = (s + tile_s - 1) // tile_s

    # Activations stay in native NCHW f32 layout: merging (ny, nx) is a free
    # reshape and there is NO separate wrapper cast pass any more.
    x3 = x_nchw.reshape(bs, cin, s)

    # 1x1-conv weight used exactly as stored (N, Cin), zero-padded to N_pad, f32.
    w = jnp.zeros((n_pad, cin), jnp.float32).at[:n, :].set(w_oi.astype(jnp.float32))

    # Per-output-channel decode constants, packed into one (N_pad, 8) slab.
    # Padded rows: A=1, B=C=Gx=Gy=bias=0 -> pure pass-through (sliced off later).
    cols = jnp.arange(n_pad)
    k = cols % no
    anc = jnp.clip(cols // no, 0, na - 1)
    valid = cols < n
    is_x = valid & (k == 0)
    is_y = valid & (k == 1)
    is_w = valid & (k == 2)
    is_h = valid & (k == 3)
    is_xy = is_x | is_y
    is_wh = is_w | is_h
    anch = jnp.where(is_w, anchors_level[anc, 0],
                     jnp.where(is_h, anchors_level[anc, 1], 0.0)).astype(jnp.float32)
    bias_pad = jnp.zeros((n_pad,), jnp.float32).at[:n].set(bias.astype(jnp.float32))
    col_a = jnp.where(is_xy, 2.0 * stride, jnp.where(is_wh, 0.0, 1.0)).astype(jnp.float32)
    col_b = 4.0 * anch
    col_c = jnp.where(is_xy, -0.5 * stride, 0.0).astype(jnp.float32)
    col_gx = jnp.where(is_x, stride, 0.0).astype(jnp.float32)
    col_gy = jnp.where(is_y, stride, 0.0).astype(jnp.float32)
    zeros = jnp.zeros((n_pad,), jnp.float32)
    consts = jnp.stack(
        [bias_pad, col_a, col_b, col_c, col_gx, col_gy, zeros, zeros],
        axis=1).astype(jnp.float32)                 # (n_pad, 8)

    grid = (bs, ns)
    raw, dec = pl.pallas_call(
        functools.partial(_detect_level_kernel, nx),
        out_shape=(jax.ShapeDtypeStruct((bs, n_pad, s), jnp.bfloat16),
                   jax.ShapeDtypeStruct((bs, n_pad, s), jnp.float32)),
        grid=grid,
        in_specs=[
            # activations: tiled over (batch, spatial) -> pipelined DMA
            pl.BlockSpec((None, cin, tile_s), lambda b, si: (b, 0, si)),
            # weight + packed constants: resident (constant block index)
            pl.BlockSpec((n_pad, cin), lambda b, si: (0, 0)),
            pl.BlockSpec((n_pad, 8), lambda b, si: (0, 0)),
        ],
        out_specs=(
            pl.BlockSpec((None, n_pad, tile_s), lambda b, si: (b, 0, si)),
            pl.BlockSpec((None, n_pad, tile_s), lambda b, si: (b, 0, si)),
        ),
        compiler_params=pltpu.CompilerParams(
            dimension_semantics=("parallel", "parallel"),
            vmem_limit_bytes=32 * 1024 * 1024),
    )(x3, w, consts)

    # Epilogue: unpad + single transpose pass per output to the PyTorch layout
    # (no=13 innermost is lane-sparse, so it stays outside the kernel).  raw is
    # read back as bf16 (half traffic) and widened to f32 in the same pass.
    # A channel-planar consumer (fused NMS / top-k) could skip this entirely.
    raw5 = raw[:, :n, :].reshape(bs, na, no, ny, nx).transpose(
        0, 1, 3, 4, 2).astype(jnp.float32)
    y5 = dec[:, :n, :].reshape(bs, na, no, ny, nx).transpose(0, 1, 3, 4, 2)
    z = y5.reshape(bs, na * ny * nx, no)
    return raw5, z


@functools.partial(jax.jit, static_argnums=(4, 5))
def detect_forward(xs, weights, biases, anchors, strides, no):
    """Full Detect.forward in eval mode: returns (z_cat, x_list).

    One jit for all levels so the per-level pallas_calls / epilogues overlap.
    """
    x_out, z_list = [], []
    for i in range(len(xs)):
        raw5, z = detect_level(xs[i], weights[i], biases[i],
                               anchors[i], float(strides[i]), no)
        x_out.append(raw5)
        z_list.append(z)
    return jnp.concatenate(z_list, axis=1), x_out


def _reference_forward(xs, weights, biases, anchors, strides, no):
    # Pure-JAX reference mirroring the PyTorch code, for verification.
    x_out, z_list = [], []
    for i in range(len(xs)):
        bs, cin, ny, nx = xs[i].shape
        na = anchors[i].shape[0]
        conv = jnp.einsum("bchw,oc->bohw", xs[i], weights[i]) + \
            biases[i][None, :, None, None]
        xi = conv.reshape(bs, na, no, ny, nx).transpose(0, 1, 3, 4, 2)
        x_out.append(xi)
        yv, xv = jnp.meshgrid(jnp.arange(ny), jnp.arange(nx), indexing="ij")
        grid = jnp.stack((xv, yv), 2).reshape(1, 1, ny, nx, 2).astype(jnp.float32)
        y = jax.nn.sigmoid(xi)
        xy = (y[..., 0:2] * 2.0 - 0.5 + grid) * strides[i]
        wh = (y[..., 2:4] * 2.0) ** 2 * anchors[i].reshape(1, na, 1, 1, 2)
        y = jnp.concatenate([xy, wh, y[..., 4:]], axis=-1)
        z_list.append(y.reshape(bs, -1, no))
    return jnp.concatenate(z_list, axis=1), x_out


if __name__ == "__main__":
    nc = 8
    no = nc + 5                              # 13
    anchors_cfg = ((10, 13, 16, 30, 33, 23),
                   (30, 61, 62, 45, 59, 119),
                   (116, 90, 156, 198, 373, 326))
    nl = len(anchors_cfg)
    na = len(anchors_cfg[0]) // 2            # 3
    ch = (4, 8, 16)
    strides = (8.0, 16.0, 32.0)
    # spatial sizes exercise all tiling paths:
    #   16x16=256 (exact 128-multiple, >=2 steps), 20x20=400 (ragged, padded
    #   trailing block), 8x8=64 (tiny full-extent block).
    spatial = (16, 20, 8)
    bs = 2
    # NOTE: spec registers anchor_grid = raw anchor values (not stride-scaled);
    # we follow the spec / reference exactly.
    anchors = jnp.asarray(anchors_cfg, dtype=jnp.float32).reshape(nl, na, 2)

    key = jax.random.PRNGKey(0)
    keys = jax.random.split(key, 3 * nl)

    weights, biases, xs = [], [], []
    for i in range(nl):
        weights.append(0.1 * jax.random.normal(
            keys[3 * i], (no * na, ch[i]), dtype=jnp.float32))
        biases.append(0.1 * jax.random.normal(
            keys[3 * i + 1], (no * na,), dtype=jnp.float32))
        xs.append(jax.random.normal(
            keys[3 * i + 2], (bs, ch[i], spatial[i], spatial[i]),
            dtype=jnp.float32))

    z_cat, x_list = detect_forward(xs, weights, biases, anchors, strides, no)
    jax.block_until_ready(z_cat)
    for xi in x_list:
        jax.block_until_ready(xi)

    # Sanity-check against plain-JAX f32 reference (raw logits pass through a
    # bf16 store -> loose tolerance on x_list; decode path is all f32).
    z_ref, x_ref = _reference_forward(xs, weights, biases, anchors, strides, no)
    total_s = sum(p * p for p in spatial)
    assert z_cat.shape == (bs, na * total_s, no)
    assert jnp.allclose(z_cat, z_ref, atol=5e-2, rtol=2e-2)
    for xi, xr in zip(x_list, x_ref):
        assert xi.shape == xr.shape
        assert jnp.allclose(xi, xr, atol=5e-2, rtol=2e-2)

    print("KERNEL_OK")
</pallas_src>

<mosaic_0001>
module attributes {stable_mosaic.version = 11 : i64} {
  func.func @_detect_level_kernel(%arg0: i32, %arg1: i32, %arg2: memref<1x8x256xf32, #tpu.memory_space<vmem>>, %arg3: memref<40x8xf32, #tpu.memory_space<vmem>>, %arg4: memref<40x8xf32, #tpu.memory_space<vmem>>, %arg5: memref<1x40x256xbf16, #tpu.memory_space<vmem>>, %arg6: memref<1x40x256xf32, #tpu.memory_space<vmem>>) attributes {dimension_semantics = [#tpu.dimension_semantics<parallel>, #tpu.dimension_semantics<parallel>], iteration_bounds = array<i64: 2, 2>, scalar_prefetch = 0 : i64, scratch_operands = 0 : i64, tpu.core_type = #tpu.core_type<tc>, window_params = [{transform_indices = @transform_0, window_bounds = array<i64: 1, 8, 256>}, {pipeline_mode = #tpu.pipeline_mode<synchronous>, transform_indices = @transform_1, window_bounds = array<i64: 40, 8>}, {pipeline_mode = #tpu.pipeline_mode<synchronous>, transform_indices = @transform_2, window_bounds = array<i64: 40, 8>}, {transform_indices = @transform_3, window_bounds = array<i64: 1, 40, 256>}, {transform_indices = @transform_4, window_bounds = array<i64: 1, 40, 256>}]} {
    %c0 = arith.constant 0 : index
    %c0_0 = arith.constant 0 : index
    %0 = vector.load %arg3[%c0, %c0_0] : memref<40x8xf32, #tpu.memory_space<vmem>>, vector<40x8xf32>
    %c0_1 = arith.constant 0 : index
    %c0_2 = arith.constant 0 : index
    %c0_3 = arith.constant 0 : index
    %1 = vector.load %arg2[%c0_1, %c0_2, %c0_3] : memref<1x8x256xf32, #tpu.memory_space<vmem>>, vector<1x8x256xf32>
    %2 = vector.shape_cast %1 : vector<1x8x256xf32> to vector<8x256xf32>
    %cst = arith.constant dense<0.000000e+00> : vector<40x256xf32>
    %3 = tpu.matmul %0, %2, %cst {dimension_numbers = #tpu.dot_dimension_numbers<[1], [0], [0], [1], [0, 0, 1, 1], [], []>} : vector<40x8xf32>, vector<8x256xf32>, vector<40x256xf32> -> vector<40x256xf32>
    %c0_4 = arith.constant 0 : index
    %c0_5 = arith.constant 0 : index
    %4 = vector.load %arg4[%c0_4, %c0_5] : memref<40x8xf32, #tpu.memory_space<vmem>>, vector<40x1xf32>
    %5 = vector.broadcast %4 : vector<40x1xf32> to vector<40x256xf32>
    %6 = arith.addf %3, %5 : vector<40x256xf32>
    %7 = arith.truncf %6 : vector<40x256xf32> to vector<40x256xbf16>
    %c0_6 = arith.constant 0 : index
    %c0_7 = arith.constant 0 : index
    %c0_8 = arith.constant 0 : index
    %8 = vector.load %arg5[%c0_6, %c0_7, %c0_8] : memref<1x40x256xbf16, #tpu.memory_space<vmem>>, vector<1x40x256xbf16>
    %9 = vector.shape_cast %8 : vector<1x40x256xbf16> to vector<40x256xbf16>
    %10 = vector.shape_cast %7 : vector<40x256xbf16> to vector<1x40x256xbf16>
    tpu.vector_store %arg5[%c0_6, %c0_7, %c0_8], %10 {strides = array<i32>} : memref<1x40x256xbf16, #tpu.memory_space<vmem>>, vector<1x40x256xbf16>,
    %11 = arith.negf %6 : vector<40x256xf32>
    %12 = math.exp %11 : vector<40x256xf32>
    %cst_9 = arith.constant 1.000000e+00 : f32
    %13 = vector.broadcast %cst_9 : f32 to vector<40x256xf32>
    %14 = arith.addf %13, %12 : vector<40x256xf32>
    %15 = arith.divf %13, %14 : vector<40x256xf32>
    %c256_i32 = arith.constant 256 : i32
    %16 = arith.muli %arg1, %c256_i32 : i32
    %17 = tpu.iota {dimensions = array<i32: 1>} : vector<1x256xi32>
    %18 = vector.broadcast %16 : i32 to vector<1x256xi32>
    %19 = arith.addi %18, %17 : vector<1x256xi32>
    %20 = arith.sitofp %19 : vector<1x256xi32> to vector<1x256xf32>
    %cst_10 = arith.constant 5.000000e-01 : f32
    %21 = vector.broadcast %cst_10 : f32 to vector<1x256xf32>
    %22 = arith.addf %20, %21 : vector<1x256xf32>
    %cst_11 = arith.constant 5.000000e-02 : f32
    %23 = vector.broadcast %cst_11 : f32 to vector<1x256xf32>
    %24 = arith.mulf %22, %23 : vector<1x256xf32>
    %25 = math.floor %24 : vector<1x256xf32>
    %cst_12 = arith.constant 2.000000e+01 : f32
    %26 = vector.broadcast %cst_12 : f32 to vector<1x256xf32>
    %27 = arith.mulf %25, %26 : vector<1x256xf32>
    %28 = arith.subf %20, %27 : vector<1x256xf32>
    %c0_13 = arith.constant 0 : index
    %c1 = arith.constant 1 : index
    %29 = vector.load %arg4[%c0_13, %c1] : memref<40x8xf32, #tpu.memory_space<vmem>>, vector<40x1xf32>
    %c0_14 = arith.constant 0 : index
    %c2 = arith.constant 2 : index
    %30 = vector.load %arg4[%c0_14, %c2] : memref<40x8xf32, #tpu.memory_space<vmem>>, vector<40x1xf32>
    %c0_15 = arith.constant 0 : index
    %c3 = arith.constant 3 : index
    %31 = vector.load %arg4[%c0_15, %c3] : memref<40x8xf32, #tpu.memory_space<vmem>>, vector<40x1xf32>
    %c0_16 = arith.constant 0 : index
    %c4 = arith.constant 4 : index
    %32 = vector.load %arg4[%c0_16, %c4] : memref<40x8xf32, #tpu.memory_space<vmem>>, vector<40x1xf32>
    %c0_17 = arith.constant 0 : index
    %c5 = arith.constant 5 : index
    %33 = vector.load %arg4[%c0_17, %c5] : memref<40x8xf32, #tpu.memory_space<vmem>>, vector<40x1xf32>
    %34 = vector.broadcast %29 : vector<40x1xf32> to vector<40x256xf32>
    %35 = arith.mulf %34, %15 : vector<40x256xf32>
    %36 = arith.mulf %15, %15 : vector<40x256xf32>
    %37 = vector.broadcast %30 : vector<40x1xf32> to vector<40x256xf32>
    %38 = arith.mulf %37, %36 : vector<40x256xf32>
    %39 = arith.addf %35, %38 : vector<40x256xf32>
    %40 = vector.broadcast %31 : vector<40x1xf32> to vector<40x256xf32>
    %41 = arith.addf %39, %40 : vector<40x256xf32>
    %42 = vector.broadcast %32 : vector<40x1xf32> to vector<40x256xf32>
    %43 = vector.broadcast %28 : vector<1x256xf32> to vector<40x256xf32>
    %44 = arith.mulf %42, %43 : vector<40x256xf32>
    %45 = arith.addf %41, %44 : vector<40x256xf32>
    %46 = vector.broadcast %33 : vector<40x1xf32> to vector<40x256xf32>
    %47 = vector.broadcast %25 : vector<1x256xf32> to vector<40x256xf32>
    %48 = arith.mulf %46, %47 : vector<40x256xf32>
    %49 = arith.addf %45, %48 : vector<40x256xf32>
    %c0_18 = arith.constant 0 : index
    %c0_19 = arith.constant 0 : index
    %c0_20 = arith.constant 0 : index
    %50 = vector.load %arg6[%c0_18, %c0_19, %c0_20] : memref<1x40x256xf32, #tpu.memory_space<vmem>>, vector<1x40x256xf32>
    %51 = vector.shape_cast %50 : vector<1x40x256xf32> to vector<40x256xf32>
    %52 = vector.shape_cast %49 : vector<40x256xf32> to vector<1x40x256xf32>
    tpu.vector_store %arg6[%c0_18, %c0_19, %c0_20], %52 {strides = array<i32>} : memref<1x40x256xf32, #tpu.memory_space<vmem>>, vector<1x40x256xf32>,
    return
  }
  func.func @transform_0(%arg0: i32, %arg1: i32) -> (i32, i32, i32) {
    %c0_i32 = arith.constant 0 : i32
    %c0_i32_0 = arith.constant 0 : i32
    return %arg0, %c0_i32, %arg1 : i32, i32, i32
  }
  func.func @transform_1(%arg0: i32, %arg1: i32) -> (i32, i32) {
    %c0_i32 = arith.constant 0 : i32
    %c0_i32_0 = arith.constant 0 : i32
    %c0_i32_1 = arith.constant 0 : i32
    return %c0_i32, %c0_i32_0 : i32, i32
  }
  func.func @transform_2(%arg0: i32, %arg1: i32) -> (i32, i32) {
    %c0_i32 = arith.constant 0 : i32
    %c0_i32_0 = arith.constant 0 : i32
    %c0_i32_1 = arith.constant 0 : i32
    return %c0_i32, %c0_i32_0 : i32, i32
  }
  func.func @transform_3(%arg0: i32, %arg1: i32) -> (i32, i32, i32) {
    %c0_i32 = arith.constant 0 : i32
    %c0_i32_0 = arith.constant 0 : i32
    return %arg0, %c0_i32, %arg1 : i32, i32, i32
  }
  func.func @transform_4(%arg0: i32, %arg1: i32) -> (i32, i32, i32) {
    %c0_i32 = arith.constant 0 : i32
    %c0_i32_0 = arith.constant 0 : i32
    return %arg0, %c0_i32, %arg1 : i32, i32, i32
  }
}

module attributes {stable_mosaic.version = 11 : i64} {
  func.func @_detect_level_kernel(%arg0: i32, %arg1: i32, %arg2: memref<1x4x128xf32, #tpu.memory_space<vmem>>, %arg3: memref<40x4xf32, #tpu.memory_space<vmem>>, %arg4: memref<40x8xf32, #tpu.memory_space<vmem>>, %arg5: memref<1x40x128xbf16, #tpu.memory_space<vmem>>, %arg6: memref<1x40x128xf32, #tpu.memory_space<vmem>>) attributes {dimension_semantics = [#tpu.dimension_semantics<parallel>, #tpu.dimension_semantics<parallel>], iteration_bounds = array<i64: 2, 2>, scalar_prefetch = 0 : i64, scratch_operands = 0 : i64, tpu.core_type = #tpu.core_type<tc>, window_params = [{transform_indices = @transform_0, window_bounds = array<i64: 1, 4, 128>}, {pipeline_mode = #tpu.pipeline_mode<synchronous>, transform_indices = @transform_1, window_bounds = array<i64: 40, 4>}, {pipeline_mode = #tpu.pipeline_mode<synchronous>, transform_indices = @transform_2, window_bounds = array<i64: 40, 8>}, {transform_indices = @transform_3, window_bounds = array<i64: 1, 40, 128>}, {transform_indices = @transform_4, window_bounds = array<i64: 1, 40, 128>}]} {
    %c0 = arith.constant 0 : index
    %c0_0 = arith.constant 0 : index
    %0 = vector.load %arg3[%c0, %c0_0] : memref<40x4xf32, #tpu.memory_space<vmem>>, vector<40x4xf32>
    %c0_1 = arith.constant 0 : index
    %c0_2 = arith.constant 0 : index
    %c0_3 = arith.constant 0 : index
    %1 = vector.load %arg2[%c0_1, %c0_2, %c0_3] : memref<1x4x128xf32, #tpu.memory_space<vmem>>, vector<1x4x128xf32>
    %2 = vector.shape_cast %1 : vector<1x4x128xf32> to vector<4x128xf32>
    %cst = arith.constant dense<0.000000e+00> : vector<40x128xf32>
    %3 = tpu.matmul %0, %2, %cst {dimension_numbers = #tpu.dot_dimension_numbers<[1], [0], [0], [1], [0, 0, 1, 1], [], []>} : vector<40x4xf32>, vector<4x128xf32>, vector<40x128xf32> -> vector<40x128xf32>
    %c0_4 = arith.constant 0 : index
    %c0_5 = arith.constant 0 : index
    %4 = vector.load %arg4[%c0_4, %c0_5] : memref<40x8xf32, #tpu.memory_space<vmem>>, vector<40x1xf32>
    %5 = vector.broadcast %4 : vector<40x1xf32> to vector<40x128xf32>
    %6 = arith.addf %3, %5 : vector<40x128xf32>
    %7 = arith.truncf %6 : vector<40x128xf32> to vector<40x128xbf16>
    %c0_6 = arith.constant 0 : index
    %c0_7 = arith.constant 0 : index
    %c0_8 = arith.constant 0 : index
    %8 = vector.load %arg5[%c0_6, %c0_7, %c0_8] : memref<1x40x128xbf16, #tpu.memory_space<vmem>>, vector<1x40x128xbf16>
    %9 = vector.shape_cast %8 : vector<1x40x128xbf16> to vector<40x128xbf16>
    %10 = vector.shape_cast %7 : vector<40x128xbf16> to vector<1x40x128xbf16>
    tpu.vector_store %arg5[%c0_6, %c0_7, %c0_8], %10 {strides = array<i32>} : memref<1x40x128xbf16, #tpu.memory_space<vmem>>, vector<1x40x128xbf16>,
    %11 = arith.negf %6 : vector<40x128xf32>
    %12 = math.exp %11 : vector<40x128xf32>
    %cst_9 = arith.constant 1.000000e+00 : f32
    %13 = vector.broadcast %cst_9 : f32 to vector<40x128xf32>
    %14 = arith.addf %13, %12 : vector<40x128xf32>
    %15 = arith.divf %13, %14 : vector<40x128xf32>
    %c128_i32 = arith.constant 128 : i32
    %16 = arith.muli %arg1, %c128_i32 : i32
    %17 = tpu.iota {dimensions = array<i32: 1>} : vector<1x128xi32>
    %18 = vector.broadcast %16 : i32 to vector<1x128xi32>
    %19 = arith.addi %18, %17 : vector<1x128xi32>
    %20 = arith.sitofp %19 : vector<1x128xi32> to vector<1x128xf32>
    %cst_10 = arith.constant 5.000000e-01 : f32
    %21 = vector.broadcast %cst_10 : f32 to vector<1x128xf32>
    %22 = arith.addf %20, %21 : vector<1x128xf32>
    %cst_11 = arith.constant 6.250000e-02 : f32
    %23 = vector.broadcast %cst_11 : f32 to vector<1x128xf32>
    %24 = arith.mulf %22, %23 : vector<1x128xf32>
    %25 = math.floor %24 : vector<1x128xf32>
    %cst_12 = arith.constant 1.600000e+01 : f32
    %26 = vector.broadcast %cst_12 : f32 to vector<1x128xf32>
    %27 = arith.mulf %25, %26 : vector<1x128xf32>
    %28 = arith.subf %20, %27 : vector<1x128xf32>
    %c0_13 = arith.constant 0 : index
    %c1 = arith.constant 1 : index
    %29 = vector.load %arg4[%c0_13, %c1] : memref<40x8xf32, #tpu.memory_space<vmem>>, vector<40x1xf32>
    %c0_14 = arith.constant 0 : index
    %c2 = arith.constant 2 : index
    %30 = vector.load %arg4[%c0_14, %c2] : memref<40x8xf32, #tpu.memory_space<vmem>>, vector<40x1xf32>
    %c0_15 = arith.constant 0 : index
    %c3 = arith.constant 3 : index
    %31 = vector.load %arg4[%c0_15, %c3] : memref<40x8xf32, #tpu.memory_space<vmem>>, vector<40x1xf32>
    %c0_16 = arith.constant 0 : index
    %c4 = arith.constant 4 : index
    %32 = vector.load %arg4[%c0_16, %c4] : memref<40x8xf32, #tpu.memory_space<vmem>>, vector<40x1xf32>
    %c0_17 = arith.constant 0 : index
    %c5 = arith.constant 5 : index
    %33 = vector.load %arg4[%c0_17, %c5] : memref<40x8xf32, #tpu.memory_space<vmem>>, vector<40x1xf32>
    %34 = vector.broadcast %29 : vector<40x1xf32> to vector<40x128xf32>
    %35 = arith.mulf %34, %15 : vector<40x128xf32>
    %36 = arith.mulf %15, %15 : vector<40x128xf32>
    %37 = vector.broadcast %30 : vector<40x1xf32> to vector<40x128xf32>
    %38 = arith.mulf %37, %36 : vector<40x128xf32>
    %39 = arith.addf %35, %38 : vector<40x128xf32>
    %40 = vector.broadcast %31 : vector<40x1xf32> to vector<40x128xf32>
    %41 = arith.addf %39, %40 : vector<40x128xf32>
    %42 = vector.broadcast %32 : vector<40x1xf32> to vector<40x128xf32>
    %43 = vector.broadcast %28 : vector<1x128xf32> to vector<40x128xf32>
    %44 = arith.mulf %42, %43 : vector<40x128xf32>
    %45 = arith.addf %41, %44 : vector<40x128xf32>
    %46 = vector.broadcast %33 : vector<40x1xf32> to vector<40x128xf32>
    %47 = vector.broadcast %25 : vector<1x128xf32> to vector<40x128xf32>
    %48 = arith.mulf %46, %47 : vector<40x128xf32>
    %49 = arith.addf %45, %48 : vector<40x128xf32>
    %c0_18 = arith.constant 0 : index
    %c0_19 = arith.constant 0 : index
    %c0_20 = arith.constant 0 : index
    %50 = vector.load %arg6[%c0_18, %c0_19, %c0_20] : memref<1x40x128xf32, #tpu.memory_space<vmem>>, vector<1x40x128xf32>
    %51 = vector.shape_cast %50 : vector<1x40x128xf32> to vector<40x128xf32>
    %52 = vector.shape_cast %49 : vector<40x128xf32> to vector<1x40x128xf32>
    tpu.vector_store %arg6[%c0_18, %c0_19, %c0_20], %52 {strides = array<i32>} : memref<1x40x128xf32, #tpu.memory_space<vmem>>, vector<1x40x128xf32>,
    return
  }
  func.func @transform_0(%arg0: i32, %arg1: i32) -> (i32, i32, i32) {
    %c0_i32 = arith.constant 0 : i32
    %c0_i32_0 = arith.constant 0 : i32
    return %arg0, %c0_i32, %arg1 : i32, i32, i32
  }
  func.func @transform_1(%arg0: i32, %arg1: i32) -> (i32, i32) {
    %c0_i32 = arith.constant 0 : i32
    %c0_i32_0 = arith.constant 0 : i32
    %c0_i32_1 = arith.constant 0 : i32
    return %c0_i32, %c0_i32_0 : i32, i32
  }
  func.func @transform_2(%arg0: i32, %arg1: i32) -> (i32, i32) {
    %c0_i32 = arith.constant 0 : i32
    %c0_i32_0 = arith.constant 0 : i32
    %c0_i32_1 = arith.constant 0 : i32
    return %c0_i32, %c0_i32_0 : i32, i32
  }
  func.func @transform_3(%arg0: i32, %arg1: i32) -> (i32, i32, i32) {
    %c0_i32 = arith.constant 0 : i32
    %c0_i32_0 = arith.constant 0 : i32
    return %arg0, %c0_i32, %arg1 : i32, i32, i32
  }
  func.func @transform_4(%arg0: i32, %arg1: i32) -> (i32, i32, i32) {
    %c0_i32 = arith.constant 0 : i32
    %c0_i32_0 = arith.constant 0 : i32
    return %arg0, %c0_i32, %arg1 : i32, i32, i32
  }
}

module attributes {stable_mosaic.version = 11 : i64} {
  func.func @_detect_level_kernel(%arg0: i32, %arg1: i32, %arg2: memref<1x16x64xf32, #tpu.memory_space<vmem>>, %arg3: memref<40x16xf32, #tpu.memory_space<vmem>>, %arg4: memref<40x8xf32, #tpu.memory_space<vmem>>, %arg5: memref<1x40x64xbf16, #tpu.memory_space<vmem>>, %arg6: memref<1x40x64xf32, #tpu.memory_space<vmem>>) attributes {dimension_semantics = [#tpu.dimension_semantics<parallel>, #tpu.dimension_semantics<parallel>], iteration_bounds = array<i64: 2, 1>, scalar_prefetch = 0 : i64, scratch_operands = 0 : i64, tpu.core_type = #tpu.core_type<tc>, window_params = [{transform_indices = @transform_0, window_bounds = array<i64: 1, 16, 64>}, {pipeline_mode = #tpu.pipeline_mode<synchronous>, transform_indices = @transform_1, window_bounds = array<i64: 40, 16>}, {pipeline_mode = #tpu.pipeline_mode<synchronous>, transform_indices = @transform_2, window_bounds = array<i64: 40, 8>}, {transform_indices = @transform_3, window_bounds = array<i64: 1, 40, 64>}, {transform_indices = @transform_4, window_bounds = array<i64: 1, 40, 64>}]} {
    %c0 = arith.constant 0 : index
    %c0_0 = arith.constant 0 : index
    %0 = vector.load %arg3[%c0, %c0_0] : memref<40x16xf32, #tpu.memory_space<vmem>>, vector<40x16xf32>
    %c0_1 = arith.constant 0 : index
    %c0_2 = arith.constant 0 : index
    %c0_3 = arith.constant 0 : index
    %1 = vector.load %arg2[%c0_1, %c0_2, %c0_3] : memref<1x16x64xf32, #tpu.memory_space<vmem>>, vector<1x16x64xf32>
    %2 = vector.shape_cast %1 : vector<1x16x64xf32> to vector<16x64xf32>
    %cst = arith.constant dense<0.000000e+00> : vector<40x64xf32>
    %3 = tpu.matmul %0, %2, %cst {dimension_numbers = #tpu.dot_dimension_numbers<[1], [0], [0], [1], [0, 0, 1, 1], [], []>} : vector<40x16xf32>, vector<16x64xf32>, vector<40x64xf32> -> vector<40x64xf32>
    %c0_4 = arith.constant 0 : index
    %c0_5 = arith.constant 0 : index
    %4 = vector.load %arg4[%c0_4, %c0_5] : memref<40x8xf32, #tpu.memory_space<vmem>>, vector<40x1xf32>
    %5 = vector.broadcast %4 : vector<40x1xf32> to vector<40x64xf32>
    %6 = arith.addf %3, %5 : vector<40x64xf32>
    %7 = arith.truncf %6 : vector<40x64xf32> to vector<40x64xbf16>
    %c0_6 = arith.constant 0 : index
    %c0_7 = arith.constant 0 : index
    %c0_8 = arith.constant 0 : index
    %8 = vector.load %arg5[%c0_6, %c0_7, %c0_8] : memref<1x40x64xbf16, #tpu.memory_space<vmem>>, vector<1x40x64xbf16>
    %9 = vector.shape_cast %8 : vector<1x40x64xbf16> to vector<40x64xbf16>
    %10 = vector.shape_cast %7 : vector<40x64xbf16> to vector<1x40x64xbf16>
    tpu.vector_store %arg5[%c0_6, %c0_7, %c0_8], %10 {strides = array<i32>} : memref<1x40x64xbf16, #tpu.memory_space<vmem>>, vector<1x40x64xbf16>,
    %11 = arith.negf %6 : vector<40x64xf32>
    %12 = math.exp %11 : vector<40x64xf32>
    %cst_9 = arith.constant 1.000000e+00 : f32
    %13 = vector.broadcast %cst_9 : f32 to vector<40x64xf32>
    %14 = arith.addf %13, %12 : vector<40x64xf32>
    %15 = arith.divf %13, %14 : vector<40x64xf32>
    %c64_i32 = arith.constant 64 : i32
    %16 = arith.muli %arg1, %c64_i32 : i32
    %17 = tpu.iota {dimensions = array<i32: 1>} : vector<1x64xi32>
    %18 = vector.broadcast %16 : i32 to vector<1x64xi32>
    %19 = arith.addi %18, %17 : vector<1x64xi32>
    %20 = arith.sitofp %19 : vector<1x64xi32> to vector<1x64xf32>
    %cst_10 = arith.constant 5.000000e-01 : f32
    %21 = vector.broadcast %cst_10 : f32 to vector<1x64xf32>
    %22 = arith.addf %20, %21 : vector<1x64xf32>
    %cst_11 = arith.constant 1.250000e-01 : f32
    %23 = vector.broadcast %cst_11 : f32 to vector<1x64xf32>
    %24 = arith.mulf %22, %23 : vector<1x64xf32>
    %25 = math.floor %24 : vector<1x64xf32>
    %cst_12 = arith.constant 8.000000e+00 : f32
    %26 = vector.broadcast %cst_12 : f32 to vector<1x64xf32>
    %27 = arith.mulf %25, %26 : vector<1x64xf32>
    %28 = arith.subf %20, %27 : vector<1x64xf32>
    %c0_13 = arith.constant 0 : index
    %c1 = arith.constant 1 : index
    %29 = vector.load %arg4[%c0_13, %c1] : memref<40x8xf32, #tpu.memory_space<vmem>>, vector<40x1xf32>
    %c0_14 = arith.constant 0 : index
    %c2 = arith.constant 2 : index
    %30 = vector.load %arg4[%c0_14, %c2] : memref<40x8xf32, #tpu.memory_space<vmem>>, vector<40x1xf32>
    %c0_15 = arith.constant 0 : index
    %c3 = arith.constant 3 : index
    %31 = vector.load %arg4[%c0_15, %c3] : memref<40x8xf32, #tpu.memory_space<vmem>>, vector<40x1xf32>
    %c0_16 = arith.constant 0 : index
    %c4 = arith.constant 4 : index
    %32 = vector.load %arg4[%c0_16, %c4] : memref<40x8xf32, #tpu.memory_space<vmem>>, vector<40x1xf32>
    %c0_17 = arith.constant 0 : index
    %c5 = arith.constant 5 : index
    %33 = vector.load %arg4[%c0_17, %c5] : memref<40x8xf32, #tpu.memory_space<vmem>>, vector<40x1xf32>
    %34 = vector.broadcast %29 : vector<40x1xf32> to vector<40x64xf32>
    %35 = arith.mulf %34, %15 : vector<40x64xf32>
    %36 = arith.mulf %15, %15 : vector<40x64xf32>
    %37 = vector.broadcast %30 : vector<40x1xf32> to vector<40x64xf32>
    %38 = arith.mulf %37, %36 : vector<40x64xf32>
    %39 = arith.addf %35, %38 : vector<40x64xf32>
    %40 = vector.broadcast %31 : vector<40x1xf32> to vector<40x64xf32>
    %41 = arith.addf %39, %40 : vector<40x64xf32>
    %42 = vector.broadcast %32 : vector<40x1xf32> to vector<40x64xf32>
    %43 = vector.broadcast %28 : vector<1x64xf32> to vector<40x64xf32>
    %44 = arith.mulf %42, %43 : vector<40x64xf32>
    %45 = arith.addf %41, %44 : vector<40x64xf32>
    %46 = vector.broadcast %33 : vector<40x1xf32> to vector<40x64xf32>
    %47 = vector.broadcast %25 : vector<1x64xf32> to vector<40x64xf32>
    %48 = arith.mulf %46, %47 : vector<40x64xf32>
    %49 = arith.addf %45, %48 : vector<40x64xf32>
    %c0_18 = arith.constant 0 : index
    %c0_19 = arith.constant 0 : index
    %c0_20 = arith.constant 0 : index
    %50 = vector.load %arg6[%c0_18, %c0_19, %c0_20] : memref<1x40x64xf32, #tpu.memory_space<vmem>>, vector<1x40x64xf32>
    %51 = vector.shape_cast %50 : vector<1x40x64xf32> to vector<40x64xf32>
    %52 = vector.shape_cast %49 : vector<40x64xf32> to vector<1x40x64xf32>
    tpu.vector_store %arg6[%c0_18, %c0_19, %c0_20], %52 {strides = array<i32>} : memref<1x40x64xf32, #tpu.memory_space<vmem>>, vector<1x40x64xf32>,
    return
  }
  func.func @transform_0(%arg0: i32, %arg1: i32) -> (i32, i32, i32) {
    %c0_i32 = arith.constant 0 : i32
    %c0_i32_0 = arith.constant 0 : i32
    return %arg0, %c0_i32, %arg1 : i32, i32, i32
  }
  func.func @transform_1(%arg0: i32, %arg1: i32) -> (i32, i32) {
    %c0_i32 = arith.constant 0 : i32
    %c0_i32_0 = arith.constant 0 : i32
    %c0_i32_1 = arith.constant 0 : i32
    return %c0_i32, %c0_i32_0 : i32, i32
  }
  func.func @transform_2(%arg0: i32, %arg1: i32) -> (i32, i32) {
    %c0_i32 = arith.constant 0 : i32
    %c0_i32_0 = arith.constant 0 : i32
    %c0_i32_1 = arith.constant 0 : i32
    return %c0_i32, %c0_i32_0 : i32, i32
  }
  func.func @transform_3(%arg0: i32, %arg1: i32) -> (i32, i32, i32) {
    %c0_i32 = arith.constant 0 : i32
    %c0_i32_0 = arith.constant 0 : i32
    return %arg0, %c0_i32, %arg1 : i32, i32, i32
  }
  func.func @transform_4(%arg0: i32, %arg1: i32) -> (i32, i32, i32) {
    %c0_i32 = arith.constant 0 : i32
    %c0_i32_0 = arith.constant 0 : i32
    return %arg0, %c0_i32, %arg1 : i32, i32, i32
  }
}

</mosaic_0001>

<bundles_post_ra>
// kernel: detect_forward.4
= control target key start
LH: loop header
LB: loop body
LE: loop exit
PB: predicated region body
PF: predicated region fallthrough
CT: control target
= control target key end

     0   :  { %s1165_s15 = smov 0   ;;  %s1167_s16 = smov 0   ;;  %s1525_s0 = inlined_call_operand.vmem [shape: f32[2,8,400], index: 0, kind: input, shape index: {}]   ;;  %s1526_s1 = inlined_call_operand.vmem [shape: f32[40,8], index: 1, kind: input, shape index: {}]   ;;  %s1527_s2 = inlined_call_operand.vmem [shape: f32[40,8], index: 2, kind: input, shape index: {}]   ;;  %s1528_s3 = inlined_call_operand.vmem [shape: bf16[2,40,400], index: 3, kind: output, shape index: {0}]   ;;  %s1529_s4 = inlined_call_operand.vmem [shape: f32[2,40,400], index: 4, kind: output, shape index: {1}]  }
   0x1   :  { %s1169_s17 = smov 0   ;;  %s1171_s18 = smov 0  }
   0x2   :  { %s1173_s19 = smov 0   ;;  %s1175_s20 = smov 0  }
   0x3   :  { %s1177_s21 = smov 0  }
   0x4 LB: > { %s24_s22 = sadd.s32 1, %s1123_s19  ;;  %s27_s23 = sadd.s32 1, %s1127_s20  ;;  %s1131_s21 = sphi %s1177_s21, %s15_s21   ;;  %s1127_s20 = sphi %s1175_s20, %s1536_s20   ;;  %s1123_s19 = sphi %s1173_s19, %s1535_s19   ;;  %s1119_s18 = sphi %s1171_s18, %s1534_s18   ;;  %s1115_s17 = sphi %s1169_s17, %s1533_s17   ;;  %s1111_s16 = sphi %s1167_s16, %s1532_s16   ;;  %s1107_s15 = sphi %s1165_s15, %s1531_s15  }
   0x5   : > { %p25_p0 = scmp.ge.s32.totalorder %s24_s22, 2  ;;  %s916_s24 = sadd.s32 4294967295, %s1131_s21  }
   0x6   : > { %p116_p1 = scmp.ne.s32.totalorder %s1111_s16, %s1107_s15  ;;  %p117_p2 = scmp.eq.s32.totalorder %s916_s24, 3 }
   0x7   : > { %s1538_s22 = smov (%p25_p0, %s24_s22), 0  ;;  %s1540_s23 = smov (!%p25_p0, %s27_s23), %s1127_s20 }
   0x8   : > { %s102_s25 = ssub.s32 %s1123_s19, %s1538_s22  ;;  %p29_p3 = scmp.ge.s32.totalorder %s1540_s23, 2 }
   0x9   : > { %p920_p4 = scmp.ge.s32.totalorder %s1131_s21, 1  ;;  %p1211_p5 = por %p117_p2, %p116_p1 }
   0xa   : > { %p188_p6 = scmp.lt.s32.totalorder %s1131_s21, 5  ;;  %s1542_s23 = smov (%p29_p3, %s1540_s23), 0 }
   0xb   : > { %s101_s27 = ssub.s32 %s1127_s20, %s1542_s23  ;;  %s106_s29 = sadd.s32 1, %s1111_s16 }
   0xc   : > { %p189_p7 = pnand %p920_p4, %p188_p6  ;;  %s103_s28 = sor.u32 %s102_s25, %s101_s27 }
   0xd   : > { %p104_p8 = scmp.eq.s32.totalorder %s103_s28, 0  ;;  %s1225_s5 = sshll.u32 (!%p189_p7), %s1115_s17, 1  ;;  %v1133_v0 = vmov (!%p189_p7), 0.0   ;;  %v1134_v1 = vmov (!%p189_p7), 0   ;;  %v1233_v2 = vld [vmem:[%s1527_s2 + $0x10] sm:$0xff] (!%p189_p7)  ;;  %v1238_v3 = vld [vmem:[%s1527_s2] sm:$0xff] (!%p189_p7)  ;;  %v479_v36 = vlaneseq (!%p189_p7) }
   0xe   : > { %192 = sbr.rel (%p189_p7) target bundleno = 305 (0x131), region = 32  ;;  %p222_p9 = scmp.lt.s32.totalorder (!%p189_p7), %s1119_s18, 1  ;;  %350 = vmatprep.mubr.f32.mxu0 (!%p189_p7), %v1133_v0  ;;  %368 = vmatprep.mubr.f32.mxu1 (!%p189_p7), %v1133_v0  ;;  %v1246_v4 = vld [vmem:[%s1527_s2 + $0x18] sm:$0xff] (!%p189_p7)  ;;  %v241_v5 = vld [vmem:[%s1527_s2 + $0x8] sm:$0xff] (!%p189_p7)  ;;  %v233_v6 = vld [vmem:[%s1526_s1] sm:$0xff] (!%p189_p7)  ;;  %vm270_vm0 = vcmask (!%p189_p7), 64512  }
   0xf   : > { %s1222_s30 = scalar_select %p104_p8, %s1111_s16, %s106_s29  }
  0x10   : > { %p224_p10 = scmp.lt.s32.totalorder (!%p189_p7), %s1225_s5, 3  ;;  %1026 = vset.pattern.permute.xlu1 (!%p189_p7), %v1134_v1  ;;  %1025 = vset.pattern.permute.xlu0 (!%p189_p7), %v1134_v1  ;;  %v236_v9 = vld [vmem:[%s1526_s1 + $0x18] sm:$0xff] (!%p189_p7)  ;;  %v244_v10 = vld [vmem:[%s1527_s2 + $0x20] sm:$0xff] (!%p189_p7)  ;;  %v234_v11 = vld [vmem:[%s1526_s1 + $0x8] sm:$0xff] (!%p189_p7)  ;;  %v1135_v13 = vmov (!%p189_p7), 1   ;;  %v1136_v15 = vmov (!%p189_p7), 2  }
  0x11   : > { %257 = vperm.xlu1 (!%p189_p7), %1026, %v1233_v2   ;;  %247 = vperm.xlu0 (!%p189_p7), %1025, %v1238_v3   ;;  %v237_v12 = vld [vmem:[%s1526_s1 + $0x20] sm:$0xff] (!%p189_p7)  ;;  %v235_v14 = vld [vmem:[%s1526_s1 + $0x10] sm:$0xff] (!%p189_p7)  ;;  %v1137_v16 = vmov (!%p189_p7), 3   ;;  %v1138_v17 = vmov (!%p189_p7), 4   ;;  %v1139_v18 = vmov (!%p189_p7), 5   ;;  %v480_v38 = vand.u32 (!%p189_p7), 127, %v479_v36 }
  0x12   : > { %s944_s7 = sshll.u32 (!%p189_p7), %s1115_s17, 8 }
  0x13   : > { %v481_v40 = vadd.s32 (!%p189_p7), 128, %v480_v38  ;;  %v482_v41 = vstv (!%p189_p7), %s944_s7 }
  0x14   : > { %v1327_v43 = vadd.s32 (!%p189_p7), %v482_v41, %v480_v38 }
  0x15   : > { %s223_s6 = scalar_select %p222_p9, %s1119_s18, 1  ;;  %262 = vperm.xlu1 %1026, %v1246_v4   ;;  %252 = vperm.xlu0 %1025, %v241_v5   ;;  %v1331_v44 = vadd.s32 %v482_v41, %v481_v40 }
  0x16   : > { %s225_s11 = scalar_select %p224_p10, %s1225_s5, 3  ;;  %v485_v54 = vcvt.s32.f32 %v1327_v43 }
  0x17   : > { %s922_s12 = sshll.u32 %s223_s6, 2  ;;  %v486_v57 = vcvt.s32.f32 %v1331_v44  ;;  %s960_s6 = smul.u32 (%p1211_p5), 20, %s1119_s18 }
  0x18   : > { %s227_s27 = sadd.s32 %s922_s12, %s225_s11 }
  0x19   : > { %s923_s28 = sshll.u32 %s227_s27, 3  ;;  %1027 = vset.pattern.permute.xlu1 %v1135_v13  ;;  %267 = vperm.xlu0 %1025, %v244_v10   ;;  %s720_s13 = sadd.s32 (%p1211_p5), %s960_s6, %s1225_s5 }
  0x1a   : > { %s229_s8 = scalar_lea.vmem %s1525_s0, %s923_s28  ;;  %504 = vperm.xlu1 %1027, %v1238_v3   ;;  %s946_s11 = sshll.u32 (%p1211_p5), %s720_s13, 2 }
  0x1b   : > { %v239_v7 = vld [vmem:[%s229_s8 + $0x8] sm:$0xff]  ;;  %v238_v8 = vld [vmem:[%s229_s8] sm:$0xff]  ;;  %s212_s8 = sand.u32 1, %s1107_s15   ;;  %s722_s24 = scalar_lea.vmem (%p1211_p5), %s1528_s3, %s946_s11 }
  0x1c   : > { %286 = vmatprep.subr.mxu0 %v239_v7  ;;  %956 = vmatprep.subr.mxu1 %v239_v7  ;;  %s958_s9 = smul.u32 40, %s212_s8  ;;  %v487_v7 = vadd.f32 0.5, %v485_v54 }
  0x1d   : > { %287 = vmatpush1.msra.mxu0 %v238_v8  ;;  %957 = vmatpush1.msra.mxu1 %v238_v8  ;;  %s1427_s10 = smul.u32 80, %s212_s8 }
  0x1e   : > { %924 = vmatmul.mubr.msk.f32.vlgmr.msra.gmra.mrb[0].mxu0 %vm270_vm0, %v233_v6  ;;  %927 = vmatmul.mubr.msk.f32.vlgmr.msra.gmra.mrb[0].mxu1 %vm270_vm0, %v236_v9  ;;  %s1339_s17 = scalar_lea.vmem [#allocation2], %s958_s9 }
  0x1f   : > { %356 = vmatprep.mubr.f32.mxu0 %v1133_v0  ;;  %374 = vmatprep.mubr.f32.mxu1 %v1133_v0  ;;  %s1446_s15 = scalar_lea.vmem [#allocation3], %s1427_s10 }
  0x20   : > { %1028 = vset.pattern.permute.xlu0 %v1135_v13  ;;  %514 = vperm.xlu1 %1027, %v1233_v2  }
  0x21   : > { %509 = vperm.xlu0 %1028, %v241_v5  }
  0x22   : > { %925 = vmatmul.mubr.msk.f32.gmra.mrb[2].mxu0 %vm270_vm0, %v234_v11  ;;  %928 = vmatmul.mubr.msk.f32.gmra.mrb[2].mxu1 %vm270_vm0, %v237_v12 }
  0x23   : > { %362 = vmatprep.mubr.f32.mxu0 %v1133_v0 }
  0x24   : > { %519 = vperm.xlu1 %1027, %v1246_v4  }
  0x25   : > { %524 = vperm.xlu0 %1028, %v244_v10  }
  0x26   : > { %926 = vmatmul.mubr.msk.f32.gmra.mrb[4].mxu0 %vm270_vm0, %v235_v14 }
  0x28   : > { %1029 = vset.pattern.permute.xlu1 %v1136_v15 }
  0x29   : > { %1030 = vset.pattern.permute.xlu0 %v1136_v15  ;;  %548 = vperm.xlu1 %1029, %v1238_v3  }
  0x2a   : > { %552 = vperm.xlu0 %1030, %v241_v5  }
  0x2d   : > { %556 = vperm.xlu1 %1029, %v1233_v2  }
  0x2e   : > { %564 = vperm.xlu0 %1030, %v244_v10  }
  0x31   : > { %560 = vperm.xlu1 %1029, %v1246_v4  }
  0x32   : > { %1032 = vset.pattern.permute.xlu0 %v1137_v16 }
  0x33   : > { %592 = vperm.xlu0 %1032, %v241_v5  }
  0x35   : > { %1031 = vset.pattern.permute.xlu1 %v1137_v16 }
  0x36   : > { %588 = vperm.xlu1 %1031, %v1238_v3  }
  0x37   : > { %604 = vperm.xlu0 %1032, %v244_v10  }
  0x3a   : > { %596 = vperm.xlu1 %1031, %v1233_v2  }
  0x3b   : > { %1034 = vset.pattern.permute.xlu0 %v1138_v17 }
  0x3c   : > { %622 = vperm.xlu0 %1034, %v241_v5  }
  0x3e   : > { %600 = vperm.xlu1 %1031, %v1246_v4  }
  0x40   : > { %634 = vperm.xlu0 %1034, %v244_v10  }
  0x42   : > { %1033 = vset.pattern.permute.xlu1 %v1138_v17 }
  0x43   : > { %618 = vperm.xlu1 %1033, %v1238_v3  }
  0x44   : > { %1036 = vset.pattern.permute.xlu0 %v1139_v18 }
  0x45   : > { %662 = vperm.xlu0 %1036, %v241_v5  }
  0x47   : > { %626 = vperm.xlu1 %1033, %v1233_v2  }
  0x49   : > { %674 = vperm.xlu0 %1036, %v244_v10   ;;  %v488_v10 = vadd.f32 0.5, %v486_v57 }
  0x4b   : > { %630 = vperm.xlu1 %1033, %v1246_v4   ;;  %v490_v36 = vmul.f32 0.05, %v488_v10 }
  0x4f   : > { %1035 = vset.pattern.permute.xlu1 %v1139_v18 }
  0x50   : > { %658 = vperm.xlu1 %1035, %v1238_v3  }
  0x54   : > { %666 = vperm.xlu1 %1035, %v1233_v2  }
  0x58   : > { %670 = vperm.xlu1 %1035, %v1246_v4  }
  0x90   : > { %v1293_v19 = vpop.permute.xlu1 %257  ;;  %v248_v23 = vpop.permute.xlu0 %247 }
  0x94   : > { %v263_v20 = vpop.permute.xlu1 %262  ;;  %v253_v25 = vpop.permute.xlu0 %252 }
  0x98   : > { %v268_v27 = vpop.permute.xlu0 %267 }
  0x99   : > { %v1295_v21 = vpop.permute.xlu1 %504 }
  0x9f   : > { %v1297_v22 = vpop.permute.xlu1 %514 }
  0xa0   : > { %v1305_v29 = vpop.permute.xlu0 %509 }
  0xa3   : > { %v1299_v24 = vpop.permute.xlu1 %519 }
  0xa4   : > { %v1309_v31 = vpop.permute.xlu0 %524 }
  0xa8   : > { %v1301_v26 = vpop.permute.xlu1 %548 }
  0xa9   : > { %v1313_v33 = vpop.permute.xlu0 %552 }
  0xac   : > { %v1303_v28 = vpop.permute.xlu1 %556 }
  0xad   : > { %v1317_v35 = vpop.permute.xlu0 %564 }
  0xb0   : > { %v1307_v30 = vpop.permute.xlu1 %560 }
  0xb2   : > { %v1322_v39 = vpop.permute.xlu0 %592 }
  0xb5   : > { %v1311_v32 = vpop.permute.xlu1 %588 }
  0xb6   : > { %v1333_v45 = vpop.permute.xlu0 %604 }
  0xb9   : > { %v1315_v34 = vpop.permute.xlu1 %596 }
  0xbb   : > { %v1347_v11 = vpop.permute.xlu0 %622 }
  0xbd   : > { %v1319_v37 = vpop.permute.xlu1 %600 }
  0xbf   : > { %v635_v41 = vpop.permute.xlu0 %634 }
  0xc2   : > { %v1325_v42 = vpop.permute.xlu1 %618 }
  0xc6   : > { %v1337_v58 = vpop.permute.xlu1 %626 }
  0xf1   : > { %v352_v46 = vpop.f32.mrb[0].mxu0  ;;  %v370_v47 = vpop.f32.mrb[0].mxu1 }
  0xf2   : > { %v353_v48 = vadd.f32 %v352_v46, %v248_v23  ;;  %v371_v49 = vadd.f32 %v370_v47, %v263_v20  ;;  %v354_v50 = vpop.f32.mrb[1].mxu0  ;;  %v372_v51 = vpop.f32.mrb[1].mxu1 }
  0xf3   : > { %v355_v52 = vadd.f32 %v354_v50, %v248_v23  ;;  %v373_v53 = vadd.f32 %v372_v51, %v263_v20  ;;  %v1350_v20 = vpop.permute.xlu1 %630 }
  0xf4   : > { %v934_v55 = vmul.f32 -1.442695, %v353_v48  ;;  %v940_v56 = vmul.f32 -1.442695, %v371_v49 }
  0xf5   : > { %v951_v59 = vpack.c.bf16 %v355_v52, %v353_v48  ;;  %v935_v60 = vmul.f32 -1.442695, %v355_v52  ;;  %v954_v61 = vpack.c.bf16 %v373_v53, %v371_v49  ;;  %v941_v62 = vmul.f32 -1.442695, %v373_v53  ;;  %v358_v63 = vpop.f32.mrb[2].mxu0  ;;  %v376_v0 = vpop.f32.mrb[2].mxu1 }
  0xf6   : > { %1037 = vpow2.f32 %v934_v55  ;;  %v359_v1 = vadd.f32 %v358_v63, %v253_v25  ;;  %v377_v2 = vadd.f32 %v376_v0, %v268_v27  ;;  %v360_v3 = vpop.f32.mrb[3].mxu0  ;;  %v378_v4 = vpop.f32.mrb[3].mxu1  ;;  %v1358_v48 = vfloor.f32 %v490_v36 }
  0xf7   : > { %1039 = vpow2.f32 %v940_v56  ;;  %413 = vst [vmem:[%s1339_s17] sm:$0xff] %v951_v59  ;;  %416 = vst [vmem:[%s1339_s17 + $0x18] sm:$0xff] %v954_v61  ;;  %v361_v5 = vadd.f32 %v360_v3, %v253_v25  ;;  %v379_v6 = vadd.f32 %v378_v4, %v268_v27  ;;  %v489_v27 = vmul.f32 0.05, %v487_v7  ;;  %v659_v49 = vpop.permute.xlu1 %658 }
  0xf8   : > { %1041 = vpow2.f32 %v935_v60  ;;  %v936_v8 = vmul.f32 -1.442695, %v359_v1  ;;  %v942_v9 = vmul.f32 -1.442695, %v377_v2  ;;  %v494_v61 = vmul.f32 20.0, %v1358_v48 }
  0xf9   : > { %1043 = vpow2.f32 %v941_v62  ;;  %v952_v12 = vpack.c.bf16 %v361_v5, %v359_v1  ;;  %v937_v13 = vmul.f32 -1.442695, %v361_v5  ;;  %v955_v14 = vpack.c.bf16 %v379_v6, %v377_v2  ;;  %v364_v15 = vpop.f32.mrb[4].mxu0  ;;  %v663_v62 = vpop.permute.xlu0 %662 }
  0xfa   : > { %1045 = vpow2.f32 %v936_v8  ;;  %v943_v16 = vmul.f32 -1.442695, %v379_v6  ;;  %v365_v17 = vadd.f32 %v364_v15, %v1293_v19  ;;  %v366_v18 = vpop.f32.mrb[5].mxu0  ;;  %v1356_v47 = vfloor.f32 %v489_v27 }
  0xfb   : > { %1047 = vpow2.f32 %v942_v9  ;;  %414 = vst [vmem:[%s1339_s17 + $0x8] sm:$0xff] %v952_v12  ;;  %417 = vst [vmem:[%s1339_s17 + $0x20] sm:$0xff] %v955_v14  ;;  %v367_v23 = vadd.f32 %v366_v18, %v1293_v19  ;;  %v1362_v3 = vpop.permute.xlu1 %666  ;;  %v1368_v9 = vsub.f32 %v486_v57, %v494_v61 }
  0xfc   : > { %1049 = vpow2.f32 %v937_v13  ;;  %v938_v25 = vmul.f32 -1.442695, %v365_v17  ;;  %v493_v60 = vmul.f32 20.0, %v1356_v47  ;;  %v1386_v18 = vmul.f32 %v663_v62, %v1356_v47 }
  0xfd   : > { %1051 = vpow2.f32 %v943_v16  ;;  %v953_v38 = vpack.c.bf16 %v367_v23, %v365_v17  ;;  %v939_v40 = vmul.f32 -1.442695, %v367_v23  ;;  %v675_v15 = vpop.permute.xlu0 %674  ;;  %v1375_v16 = vmul.f32 %v1347_v11, %v1368_v9 }
  0xfe   : > { %1053 = vpow2.f32 %v938_v25  ;;  %v495_v8 = vsub.f32 %v485_v54, %v493_v60  ;;  %v1380_v44 = vmul.f32 %v635_v41, %v1368_v9  ;;  %v638_v57 = vmul.f32 %v1325_v42, %v1368_v9 }
  0xff   : > { %415 = vst [vmem:[%s1339_s17 + $0x10] sm:$0xff] %v953_v38  ;;  %1055 = vpow2.f32 %v939_v40  ;;  %v671_v17 = vpop.permute.xlu1 %670  ;;  %v1395_v27 = vmul.f32 %v675_v15, %v1356_v47  ;;  %v1398_v36 = vmul.f32 %v675_v15, %v1358_v48 }
 0x100   : > { %v1038_v46 = vpop.eup %1037  ;;  %v1371_v14 = vmul.f32 %v1347_v11, %v495_v8  ;;  %v1377_v43 = vmul.f32 %v635_v41, %v495_v8  ;;  %v637_v54 = vmul.f32 %v1325_v42, %v495_v8  ;;  %v1389_v25 = vmul.f32 %v1337_v58, %v495_v8 }
 0x101   : > { %v1040_v50 = vpop.eup %1039  ;;  %v448_v51 = vadd.f32 1.0, %v1038_v46  ;;  %v1392_v11 = vmul.f32 %v663_v62, %v1358_v48  ;;  %v643_v42 = vmul.f32 %v1350_v20, %v495_v8  ;;  %v644_v41 = vmul.f32 %v1350_v20, %v1368_v9 }
 0x102   : > { %v1042_v19 = vpop.eup %1041  ;;  %v454_v52 = vadd.f32 1.0, %v1040_v50  ;;  %v677_v46 = vmul.f32 %v659_v49, %v1356_v47 }
 0x103   : > { %v1044_v53 = vpop.eup %1043  ;;  %1057 = vrcp.f32 %v448_v51  ;;  %v449_v55 = vadd.f32 1.0, %v1042_v19  ;;  %v678_v19 = vmul.f32 %v659_v49, %v1358_v48 }
 0x104   : > { %v1046_v56 = vpop.eup %1045  ;;  %1059 = vrcp.f32 %v454_v52  ;;  %v455_v59 = vadd.f32 1.0, %v1044_v53  ;;  %v1406_v52 = vmul.f32 %v671_v17, %v1356_v47  ;;  %v1409_v53 = vmul.f32 %v671_v17, %v1358_v48 }
 0x105   : > { %v1048_v63 = vpop.eup %1047  ;;  %1061 = vrcp.f32 %v449_v55  ;;  %v450_v0 = vadd.f32 1.0, %v1046_v56 }
 0x106   : > { %v1050_v1 = vpop.eup %1049  ;;  %1063 = vrcp.f32 %v455_v59  ;;  %v456_v2 = vadd.f32 1.0, %v1048_v63 }
 0x107   : > { %v1052_v4 = vpop.eup %1051  ;;  %1065 = vrcp.f32 %v450_v0  ;;  %v451_v5 = vadd.f32 1.0, %v1050_v1 }
 0x108   : > { %v1054_v6 = vpop.eup %1053  ;;  %1067 = vrcp.f32 %v456_v2  ;;  %v457_v7 = vadd.f32 1.0, %v1052_v4 }
 0x109   : > { %v1056_v10 = vpop.eup %1055  ;;  %1069 = vrcp.f32 %v451_v5  ;;  %v452_v12 = vadd.f32 1.0, %v1054_v6 }
 0x10a   : > { %1071 = vrcp.f32 %v457_v7  ;;  %v453_v13 = vadd.f32 1.0, %v1056_v10 }
 0x10b   : > { %1073 = vrcp.f32 %v452_v12 }
 0x10c   : > { %1075 = vrcp.f32 %v453_v13 }
 0x10d   : > { %v1058_v23 = vpop.eup %1057 }
 0x10e   : > { %v1060_v38 = vpop.eup %1059  ;;  %v537_v40 = vmul.f32 %v1058_v23, %v1058_v23  ;;  %v527_v56 = vmul.f32 %v1058_v23, %v1295_v21 }
 0x10f   : > { %v1062_v50 = vpop.eup %1061  ;;  %v543_v51 = vmul.f32 %v1060_v38, %v1060_v38  ;;  %v533_v20 = vmul.f32 %v1060_v38, %v1299_v24 }
 0x110   : > { %v1064_v55 = vpop.eup %1063  ;;  %v538_v59 = vmul.f32 %v1062_v50, %v1062_v50  ;;  %v567_v60 = vmul.f32 %v1301_v26, %v537_v40  ;;  %v528_v62 = vmul.f32 %v1062_v50, %v1295_v21 }
 0x111   : > { %v1066_v61 = vpop.eup %1065  ;;  %v534_v63 = vmul.f32 %v1064_v55, %v1299_v24  ;;  %v544_v49 = vmul.f32 %v1064_v55, %v1064_v55  ;;  %v573_v0 = vmul.f32 %v1307_v30, %v543_v51 }
 0x112   : > { %v1068_v1 = vpop.eup %1067  ;;  %v568_v2 = vmul.f32 %v1301_v26, %v538_v59  ;;  %v577_v4 = vadd.f32 %v567_v60, %v527_v56  ;;  %v539_v5 = vmul.f32 %v1066_v61, %v1066_v61  ;;  %v529_v6 = vmul.f32 %v1066_v61, %v1305_v29 }
 0x113   : > { %v1070_v7 = vpop.eup %1069  ;;  %v535_v8 = vmul.f32 %v1068_v1, %v1309_v31  ;;  %v574_v10 = vmul.f32 %v1307_v30, %v544_v49  ;;  %v583_v12 = vadd.f32 %v573_v0, %v533_v20  ;;  %v545_v21 = vmul.f32 %v1068_v1, %v1068_v1 }
 0x114   : > { %v1072_v13 = vpop.eup %1071  ;;  %v578_v24 = vadd.f32 %v568_v2, %v528_v62  ;;  %v607_v15 = vadd.f32 %v1311_v32, %v577_v4  ;;  %v540_v17 = vmul.f32 %v1070_v7, %v1070_v7  ;;  %v569_v23 = vmul.f32 %v1313_v33, %v539_v5 }
 0x115   : > { %v1074_v26 = vpop.eup %1073  ;;  %v584_v38 = vadd.f32 %v574_v10, %v534_v63  ;;  %v613_v40 = vadd.f32 %v1319_v37, %v583_v12  ;;  %v546_v50 = vmul.f32 %v1072_v13, %v1072_v13  ;;  %v575_v51 = vmul.f32 %v1317_v35, %v545_v21 }
 0x116   : > { %v1076_v55 = vpop.eup %1075  ;;  %v608_v30 = vadd.f32 %v1311_v32, %v578_v24  ;;  %v570_v56 = vmul.f32 %v1313_v33, %v540_v17  ;;  %v647_v59 = vadd.f32 %v637_v54, %v607_v15  ;;  %v530_v60 = vmul.f32 %v1070_v7, %v1305_v29 }
 0x117   : > { %v614_v20 = vadd.f32 %v1319_v37, %v584_v38  ;;  %v576_v61 = vmul.f32 %v1317_v35, %v546_v50  ;;  %v579_v62 = vadd.f32 %v569_v23, %v529_v6  ;;  %v531_v63 = vmul.f32 %v1074_v26, %v1297_v22 }
 0x118   : > { %v648_v49 = vadd.f32 %v638_v57, %v608_v30  ;;  %v580_v0 = vadd.f32 %v570_v56, %v530_v60  ;;  %v532_v1 = vmul.f32 %v1076_v55, %v1297_v22  ;;  %v541_v2 = vmul.f32 %v1074_v26, %v1074_v26 }
 0x119   : > { %v609_v4 = vadd.f32 %v1322_v39, %v579_v62  ;;  %v542_v32 = vmul.f32 %v1076_v55, %v1076_v55  ;;  %v536_v33 = vmul.f32 %v1072_v13, %v1309_v31  ;;  %v585_v54 = vadd.f32 %v575_v51, %v535_v8 }
 0x11a   : > { %v610_v29 = vadd.f32 %v1322_v39, %v580_v0  ;;  %v571_v37 = vmul.f32 %v1303_v28, %v541_v2  ;;  %v653_v35 = vadd.f32 %v643_v42, %v613_v40  ;;  %v654_v5 = vadd.f32 %v644_v41, %v614_v20 }
 0x11b   : > { %v572_v6 = vmul.f32 %v1303_v28, %v542_v32  ;;  %v586_v57 = vadd.f32 %v576_v61, %v536_v33  ;;  %v615_v7 = vadd.f32 %v1333_v45, %v585_v54  ;;  %v687_v22 = vadd.f32 %v677_v46, %v647_v59 }
 0x11c   : > { %v581_v10 = vadd.f32 %v571_v37, %v531_v63  ;;  %v688_v12 = vadd.f32 %v678_v19, %v648_v49  ;;  %v649_v21 = vadd.f32 %v1371_v14, %v609_v4  ;;  %v650_v31 = vadd.f32 %v1375_v16, %v610_v29 }
 0x11d   : > { %v582_v13 = vadd.f32 %v572_v6, %v532_v1  ;;  %v616_v8 = vadd.f32 %v1333_v45, %v586_v57  ;;  %697 = vst [vmem:[%s1446_s15] sm:$0xff] %v687_v22  ;;  %v655_v28 = vadd.f32 %v1377_v43, %v615_v7  ;;  %v693_v39 = vadd.f32 %v1406_v52, %v653_v35 }
 0x11e   : > { %v611_v14 = vadd.f32 %v1315_v34, %v581_v10  ;;  %698 = vst [vmem:[%s1446_s15 + $0x8] sm:$0xff] %v688_v12  ;;  %v694_v16 = vadd.f32 %v1409_v53, %v654_v5  ;;  %v689_v45 = vadd.f32 %v1386_v18, %v649_v21  ;;  %v690_v42 = vadd.f32 %v1392_v11, %v650_v31 }
 0x11f   : > { %v612_v41 = vadd.f32 %v1315_v34, %v582_v13  ;;  %v642_v46 = vmul.f32 %v1337_v58, %v1368_v9  ;;  %v656_v43 = vadd.f32 %v1380_v44, %v616_v8  ;;  %703 = vst [vmem:[%s1446_s15 + $0x30] sm:$0xff] %v693_v39  ;;  %v695_v19 = vadd.f32 %v1395_v27, %v655_v28  ;;  %717 = sbr.rel (!%p1211_p5) target bundleno = 294 (0x126), region = 36  ;;  %v766_v27 = vld [vmem:[%s1339_s17 + $0x20] sm:$0xff] (%p1211_p5) }
 0x120   : > { %v651_v52 = vadd.f32 %v1389_v25, %v611_v14  ;;  %v681_v18 = vmul.f32 %v1362_v3, %v1356_v47  ;;  %704 = vst [vmem:[%s1446_s15 + $0x38] sm:$0xff] %v694_v16  ;;  %699 = vst [vmem:[%s1446_s15 + $0x10] sm:$0xff] %v689_v45  ;;  %v682_v11 = vmul.f32 %v1362_v3, %v1358_v48  ;;  %v758_v47 = vld [vmem:[%s1339_s17] sm:$0xff] (%p1211_p5)  ;;  %v760_v48 = vld [vmem:[%s1339_s17 + $0x8] sm:$0xff] (%p1211_p5) }
 0x121   : > { %700 = vst [vmem:[%s1446_s15 + $0x18] sm:$0xff] %v690_v42  ;;  %v652_v34 = vadd.f32 %v642_v46, %v612_v41  ;;  %v696_v58 = vadd.f32 %v1398_v36, %v656_v43  ;;  %705 = vst [vmem:[%s1446_s15 + $0x40] sm:$0xff] %v695_v19  ;;  %v762_v3 = vld [vmem:[%s1339_s17 + $0x10] sm:$0xff] (%p1211_p5)  ;;  %v764_v25 = vld [vmem:[%s1339_s17 + $0x18] sm:$0xff] (%p1211_p5) }
 0x122   : > { %v691_v9 = vadd.f32 %v681_v18, %v651_v52  ;;  %759 = vst [vmem:[%s722_s24] sm:$0xff] (%p1211_p5), %v758_v47  ;;  %761 = vst [vmem:[%s722_s24 + $0x10] sm:$0xff] (%p1211_p5), %v760_v48 }
 0x123   : > { %v692_v44 = vadd.f32 %v682_v11, %v652_v34  ;;  %706 = vst [vmem:[%s1446_s15 + $0x48] sm:$0xff] %v696_v58  ;;  %763 = vst [vmem:[%s722_s24 + $0x20] sm:$0xff] (%p1211_p5), %v762_v3 }
 0x124   : > { %701 = vst [vmem:[%s1446_s15 + $0x20] sm:$0xff] %v691_v9  ;;  %765 = vst [vmem:[%s722_s24 + $0x30] sm:$0xff] (%p1211_p5), %v764_v25 }
 0x125   : > { %702 = vst [vmem:[%s1446_s15 + $0x28] sm:$0xff] %v692_v44  ;;  %767 = vst [vmem:[%s722_s24 + $0x40] sm:$0xff] (%p1211_p5), %v766_v27 }
 0x126 PF: > { %773 = sbr.rel (!%p1211_p5) target bundleno = 305 (0x131), region = 74  ;;  %v791_v36 = vld [vmem:[%s1446_s15] sm:$0xff] (%p1211_p5)  ;;  %v793_v53 = vld [vmem:[%s1446_s15 + $0x8] sm:$0xff] (%p1211_p5)  ;;  %v803_v26 = vld [vmem:[%s1446_s15 + $0x30] sm:$0xff] (%p1211_p5) }
 0x127   : > { %s961_s25 = smul.u32 (%p1211_p5), 20, %s1119_s18  ;;  %v795_v24 = vld [vmem:[%s1446_s15 + $0x10] sm:$0xff] (%p1211_p5)  ;;  %v805_v38 = vld [vmem:[%s1446_s15 + $0x38] sm:$0xff] (%p1211_p5) }
 0x128   : > { %v797_v15 = vld [vmem:[%s1446_s15 + $0x18] sm:$0xff] (%p1211_p5)  ;;  %v807_v40 = vld [vmem:[%s1446_s15 + $0x40] sm:$0xff] (%p1211_p5) }
 0x129   : > { %s776_s26 = sadd.s32 (%p1211_p5), %s961_s25, %s1225_s5 }
 0x12a   : > { %s948_s27 = sshll.u32 (%p1211_p5), %s776_s26, 3  ;;  %v809_v50 = vld [vmem:[%s1446_s15 + $0x48] sm:$0xff] (%p1211_p5) }
 0x12b   : > { %v799_v17 = vld [vmem:[%s1446_s15 + $0x20] sm:$0xff] (%p1211_p5)  ;;  %s778_s7 = scalar_lea.vmem (%p1211_p5), %s1529_s4, %s948_s27 }
 0x12c   : > { %v801_v23 = vld [vmem:[%s1446_s15 + $0x28] sm:$0xff] (%p1211_p5)  ;;  %792 = vst [vmem:[%s778_s7] sm:$0xff] (%p1211_p5), %v791_v36  ;;  %794 = vst [vmem:[%s778_s7 + $0x8] sm:$0xff] (%p1211_p5), %v793_v53 }
 0x12d   : > { %796 = vst [vmem:[%s778_s7 + $0x20] sm:$0xff] %v795_v24  ;;  %798 = vst [vmem:[%s778_s7 + $0x28] sm:$0xff] %v797_v15 }
 0x12e   : > { %800 = vst [vmem:[%s778_s7 + $0x40] sm:$0xff] %v799_v17  ;;  %802 = vst [vmem:[%s778_s7 + $0x48] sm:$0xff] %v801_v23 }
 0x12f   : > { %804 = vst [vmem:[%s778_s7 + $0x60] sm:$0xff] %v803_v26  ;;  %806 = vst [vmem:[%s778_s7 + $0x68] sm:$0xff] %v805_v38 }
 0x130   : > { %808 = vst [vmem:[%s778_s7 + $0x80] sm:$0xff] %v807_v40  ;;  %810 = vst [vmem:[%s778_s7 + $0x88] sm:$0xff] %v809_v50 }
 0x131 PF: > { %s15_s21 = sadd.s32 1, %s1131_s21   ;;  %s1531_s15 = smov %s1111_s16 }
 0x132   : > { %p12_p11 = scmp.ge.s32.totalorder %s15_s21, 6   ;;  %s1532_s16 = smov %s1222_s30 }
 0x133   : > { %s1533_s17 = smov %s1123_s19  ;;  %s1534_s18 = smov %s1127_s20 }
 0x134   : > { %s1535_s19 = smov %s1538_s22  ;;  %s1536_s20 = smov %s1542_s23 }
 0x135   :  { %14 = sbr.rel (!%p12_p11) target bundleno = 4 (0x4), region = 135 }

// kernel: detect_forward.3
= control target key start
LH: loop header
LB: loop body
LE: loop exit
PB: predicated region body
PF: predicated region fallthrough
CT: control target
= control target key end

     0   :  { %s1082_s15 = smov 0   ;;  %s1084_s16 = smov 0   ;;  %s1337_s0 = inlined_call_operand.vmem [shape: f32[2,4,256], index: 0, kind: input, shape index: {}]   ;;  %s1338_s1 = inlined_call_operand.vmem [shape: f32[40,4], index: 1, kind: input, shape index: {}]   ;;  %s1339_s2 = inlined_call_operand.vmem [shape: f32[40,8], index: 2, kind: input, shape index: {}]   ;;  %s1340_s3 = inlined_call_operand.vmem [shape: bf16[2,40,256], index: 3, kind: output, shape index: {0}]   ;;  %s1341_s4 = inlined_call_operand.vmem [shape: f32[2,40,256], index: 4, kind: output, shape index: {1}]  }
   0x1   :  { %s1086_s17 = smov 0   ;;  %s1088_s18 = smov 0  }
   0x2   :  { %s1090_s19 = smov 0   ;;  %s1092_s20 = smov 0  }
   0x3   :  { %s1094_s21 = smov 0  }
   0x4 LB: > { %s24_s22 = sadd.s32 1, %s1039_s19  ;;  %s27_s23 = sadd.s32 1, %s1043_s20  ;;  %s1047_s21 = sphi %s1094_s21, %s15_s21   ;;  %s1043_s20 = sphi %s1092_s20, %s1348_s20   ;;  %s1039_s19 = sphi %s1090_s19, %s1347_s19   ;;  %s1035_s18 = sphi %s1088_s18, %s1346_s18   ;;  %s1031_s17 = sphi %s1086_s17, %s1345_s17   ;;  %s1027_s16 = sphi %s1084_s16, %s1344_s16   ;;  %s1023_s15 = sphi %s1082_s15, %s1343_s15  }
   0x5   : > { %p25_p0 = scmp.ge.s32.totalorder %s24_s22, 2  ;;  %s824_s24 = sadd.s32 4294967295, %s1047_s21  }
   0x6   : > { %p116_p1 = scmp.ne.s32.totalorder %s1027_s16, %s1023_s15  ;;  %p117_p2 = scmp.eq.s32.totalorder %s824_s24, 3 }
   0x7   : > { %s1350_s22 = smov (%p25_p0, %s24_s22), 0  ;;  %s1352_s23 = smov (!%p25_p0, %s27_s23), %s1043_s20 }
   0x8   : > { %s102_s25 = ssub.s32 %s1039_s19, %s1350_s22  ;;  %p29_p3 = scmp.ge.s32.totalorder %s1352_s23, 2 }
   0x9   : > { %p828_p4 = scmp.ge.s32.totalorder %s1047_s21, 1  ;;  %p1128_p5 = por %p117_p2, %p116_p1 }
   0xa   : > { %p186_p6 = scmp.lt.s32.totalorder %s1047_s21, 5  ;;  %s1354_s23 = smov (%p29_p3, %s1352_s23), 0 }
   0xb   : > { %s101_s27 = ssub.s32 %s1043_s20, %s1354_s23  ;;  %s106_s29 = sadd.s32 1, %s1027_s16 }
   0xc   : > { %p187_p7 = pnand %p828_p4, %p186_p6  ;;  %s103_s28 = sor.u32 %s102_s25, %s101_s27 }
   0xd   : > { %p104_p8 = scmp.eq.s32.totalorder %s103_s28, 0  ;;  %p218_p9 = scmp.lt.s32.totalorder (!%p187_p7), %s1035_s18, 1  ;;  %v1049_v0 = vmov (!%p187_p7), 0.0   ;;  %vm1050_vm0 = vmmov (!%p187_p7), 0   ;;  %v1149_v1 = vld [vmem:[%s1339_s2 + $0x10] sm:$0xff] (!%p187_p7)  ;;  %v1051_v2 = vmov (!%p187_p7), 0   ;;  %v429_v35 = vlaneseq (!%p187_p7) }
   0xe   : > { %190 = sbr.rel (%p187_p7) target bundleno = 299 (0x12b), region = 32  ;;  %p220_p10 = scmp.lt.s32.totalorder (!%p187_p7), %s1031_s17, 1  ;;  %874 = vmatprep.subr.mxu0 (!%p187_p7), %v1049_v0  ;;  %891 = vmatprep.subr.mxu1 (!%p187_p7), %v1049_v0  ;;  %v1155_v3 = vld [vmem:[%s1339_s2] sm:$0xff] (!%p187_p7)  ;;  %v1162_v4 = vld [vmem:[%s1339_s2 + $0x18] sm:$0xff] (!%p187_p7)  ;;  %v233_v5 = vld [vmem:[%s1339_s2 + $0x8] sm:$0xff] (!%p187_p7)  ;;  %vm278_vm1 = vcmask (!%p187_p7), 1043456  }
   0xf   : > { %s1139_s30 = scalar_select %p104_p8, %s1027_s16, %s106_s29  }
  0x10   : > { %876 = vmatprep.mubr.msk.f32.mxu0 (!%p187_p7), %vm1050_vm0, %v1049_v0  ;;  %885 = vmatprep.mubr.msk.f32.mxu1 (!%p187_p7), %vm1050_vm0, %v1049_v0  ;;  %v226_v6 = vld [vmem:[%s1338_s1] sm:$0xff] (!%p187_p7)  ;;  %vm262_vm2 = vcmask (!%p187_p7), 31744   ;;  %v229_v7 = vld [vmem:[%s1338_s1 + $0x18] sm:$0xff] (!%p187_p7)  ;;  %v227_v10 = vld [vmem:[%s1338_s1 + $0x8] sm:$0xff] (!%p187_p7)  ;;  %v1052_v12 = vmov (!%p187_p7), 1   ;;  %v1053_v14 = vmov (!%p187_p7), 2  }
  0x11   : > { %962 = vset.pattern.permute.xlu1 (!%p187_p7), %v1051_v2  ;;  %961 = vset.pattern.permute.xlu0 (!%p187_p7), %v1051_v2  ;;  %v236_v9 = vld [vmem:[%s1339_s2 + $0x20] sm:$0xff] (!%p187_p7)  ;;  %v228_v13 = vld [vmem:[%s1338_s1 + $0x10] sm:$0xff] (!%p187_p7)  ;;  %v1054_v15 = vmov (!%p187_p7), 3   ;;  %v1055_v16 = vmov (!%p187_p7), 4   ;;  %v1056_v17 = vmov (!%p187_p7), 5   ;;  %s209_s28 = sand.u32 (!%p187_p7), 1, %s1023_s15  }
  0x12   : > { %249 = vperm.xlu1 (!%p187_p7), %962, %v1149_v1   ;;  %239 = vperm.xlu0 (!%p187_p7), %961, %v1155_v3   ;;  %v230_v11 = vld [vmem:[%s1338_s1 + $0x20] sm:$0xff] (!%p187_p7)  ;;  %s847_s29 = sshll.u32 (!%p187_p7), %s1031_s17, 7  ;;  %v430_v43 = vand.u32 (!%p187_p7), 127, %v429_v35  ;;  %s1264_s7 = smul.u32 (!%p187_p7), 40, %s209_s28 }
  0x13   : > { %v431_v46 = vstv (!%p187_p7), %s847_s29 }
  0x14   : > { %v432_v54 = vadd.s32 (!%p187_p7), %v431_v46, %v430_v43  ;;  %s1282_s15 = scalar_lea.vmem (!%p187_p7), [#allocation3], %s1264_s7 }
  0x15   : > { %s219_s5 = scalar_select %p218_p9, %s1035_s18, 1 }
  0x16   : > { %s221_s8 = scalar_select %p220_p10, %s1031_s17, 1  ;;  %254 = vperm.xlu1 %962, %v1162_v4   ;;  %244 = vperm.xlu0 %961, %v233_v5  }
  0x17   : > { %s829_s11 = sshll.u32 %s219_s5, 1 }
  0x18   : > { %s223_s12 = sadd.s32 %s829_s11, %s221_s8  ;;  %s895_s8 = smul.u32 (%p1128_p5), 10, %s1035_s18 }
  0x19   : > { %s830_s27 = sshll.u32 %s223_s12, 2 }
  0x1a   : > { %s225_s5 = scalar_lea.vmem %s1337_s0, %s830_s27  ;;  %963 = vset.pattern.permute.xlu1 %v1052_v12  ;;  %259 = vperm.xlu0 %961, %v236_v9   ;;  %s611_s9 = sadd.s32 (%p1128_p5), %s1031_s17, %s895_s8 }
  0x1b   : > { %v231_v8 = vld [vmem:[%s225_s5] sm:$0xf]  ;;  %446 = vperm.xlu1 %963, %v1155_v3   ;;  %s893_s5 = smul.u32 20, %s209_s28  ;;  %s848_s10 = sshll.u32 (%p1128_p5), %s611_s9, 2 }
  0x1c   : > { %875 = vmatpush3.msk.msra.mxu0 %vm278_vm1, %v231_v8  ;;  %892 = vmatpush3.msk.msra.mxu1 %vm278_vm1, %v231_v8  ;;  %s613_s13 = scalar_lea.vmem (%p1128_p5), %s1340_s3, %s848_s10 }
  0x1d   : > { %877 = vmatmul.mubr.msk.f32.vlgmr.msra.gmra.mrb[0].mxu0 %vm262_vm2, %v226_v6  ;;  %886 = vmatmul.mubr.msk.f32.vlgmr.msra.gmra.mrb[0].mxu1 %vm262_vm2, %v229_v7  ;;  %s1246_s6 = scalar_lea.vmem [#allocation2], %s893_s5 }
  0x1e   : > { %879 = vmatprep.mubr.msk.f32.mxu0 %vm1050_vm0, %v1049_v0  ;;  %888 = vmatprep.mubr.msk.f32.mxu1 %vm1050_vm0, %v1049_v0 }
  0x1f   : > { %964 = vset.pattern.permute.xlu0 %v1052_v12  ;;  %456 = vperm.xlu1 %963, %v1149_v1  }
  0x20   : > { %451 = vperm.xlu0 %964, %v233_v5  }
  0x21   : > { %880 = vmatmul.mubr.msk.f32.gmra.mrb[2].mxu0 %vm262_vm2, %v227_v10  ;;  %889 = vmatmul.mubr.msk.f32.gmra.mrb[2].mxu1 %vm262_vm2, %v230_v11 }
  0x22   : > { %882 = vmatprep.mubr.msk.f32.mxu0 %vm1050_vm0, %v1049_v0  ;;  %v433_v0 = vcvt.s32.f32 %v432_v54 }
  0x23   : > { %461 = vperm.xlu1 %963, %v1162_v4  }
  0x24   : > { %466 = vperm.xlu0 %964, %v236_v9  }
  0x25   : > { %883 = vmatmul.mubr.msk.f32.gmra.mrb[4].mxu0 %vm262_vm2, %v228_v13 }
  0x27   : > { %965 = vset.pattern.permute.xlu1 %v1053_v14 }
  0x28   : > { %966 = vset.pattern.permute.xlu0 %v1053_v14  ;;  %480 = vperm.xlu1 %965, %v1155_v3  }
  0x29   : > { %484 = vperm.xlu0 %966, %v233_v5  }
  0x2c   : > { %488 = vperm.xlu1 %965, %v1149_v1  }
  0x2d   : > { %496 = vperm.xlu0 %966, %v236_v9  }
  0x30   : > { %492 = vperm.xlu1 %965, %v1162_v4  }
  0x31   : > { %968 = vset.pattern.permute.xlu0 %v1054_v15 }
  0x32   : > { %514 = vperm.xlu0 %968, %v233_v5  }
  0x34   : > { %967 = vset.pattern.permute.xlu1 %v1054_v15 }
  0x35   : > { %510 = vperm.xlu1 %967, %v1155_v3  }
  0x36   : > { %526 = vperm.xlu0 %968, %v236_v9  }
  0x39   : > { %518 = vperm.xlu1 %967, %v1149_v1  }
  0x3a   : > { %970 = vset.pattern.permute.xlu0 %v1055_v16 }
  0x3b   : > { %539 = vperm.xlu0 %970, %v233_v5  }
  0x3d   : > { %522 = vperm.xlu1 %967, %v1162_v4  }
  0x3f   : > { %551 = vperm.xlu0 %970, %v236_v9  }
  0x41   : > { %969 = vset.pattern.permute.xlu1 %v1055_v16 }
  0x42   : > { %535 = vperm.xlu1 %969, %v1155_v3  }
  0x43   : > { %972 = vset.pattern.permute.xlu0 %v1056_v17 }
  0x44   : > { %569 = vperm.xlu0 %972, %v233_v5  }
  0x46   : > { %543 = vperm.xlu1 %969, %v1149_v1  }
  0x48   : > { %581 = vperm.xlu0 %972, %v236_v9  }
  0x4a   : > { %547 = vperm.xlu1 %969, %v1162_v4  }
  0x4e   : > { %971 = vset.pattern.permute.xlu1 %v1056_v17 }
  0x4f   : > { %565 = vperm.xlu1 %971, %v1155_v3  }
  0x53   : > { %573 = vperm.xlu1 %971, %v1149_v1  }
  0x57   : > { %577 = vperm.xlu1 %971, %v1162_v4   ;;  %v434_v4 = vadd.f32 0.5, %v433_v0 }
  0x59   : > { %v435_v10 = vmul.f32 0.0625, %v434_v4 }
  0x5b   : > { %v1255_v17 = vfloor.f32 %v435_v10 }
  0x91   : > { %v250_v18 = vpop.permute.xlu1 %249  ;;  %v240_v23 = vpop.permute.xlu0 %239 }
  0x95   : > { %v255_v19 = vpop.permute.xlu1 %254  ;;  %v245_v25 = vpop.permute.xlu0 %244 }
  0x99   : > { %v260_v27 = vpop.permute.xlu0 %259 }
  0x9a   : > { %v1212_v20 = vpop.permute.xlu1 %446 }
  0x9e   : > { %v1214_v21 = vpop.permute.xlu1 %456 }
  0x9f   : > { %v1224_v29 = vpop.permute.xlu0 %451 }
  0xa2   : > { %v1216_v22 = vpop.permute.xlu1 %461 }
  0xa3   : > { %v1228_v31 = vpop.permute.xlu0 %466 }
  0xa7   : > { %v1218_v24 = vpop.permute.xlu1 %480 }
  0xa8   : > { %v1232_v33 = vpop.permute.xlu0 %484 }
  0xab   : > { %v1220_v26 = vpop.permute.xlu1 %488 }
  0xac   : > { %v1237_v36 = vpop.permute.xlu0 %496 }
  0xaf   : > { %v1222_v28 = vpop.permute.xlu1 %492 }
  0xb1   : > { %v1244_v59 = vpop.permute.xlu0 %514 }
  0xb4   : > { %v1226_v30 = vpop.permute.xlu1 %510 }
  0xb5   : > { %v1253_v3 = vpop.permute.xlu0 %526 }
  0xb8   : > { %v1230_v32 = vpop.permute.xlu1 %518 }
  0xba   : > { %v540_v12 = vpop.permute.xlu0 %539 }
  0xbc   : > { %v1234_v34 = vpop.permute.xlu1 %522 }
  0xc1   : > { %v1242_v47 = vpop.permute.xlu1 %535 }
  0xc5   : > { %v1250_v63 = vpop.permute.xlu1 %543 }
  0xc9   : > { %v548_v6 = vpop.permute.xlu1 %547 }
  0xce   : > { %v566_v16 = vpop.permute.xlu1 %565 }
  0xf0   : > { %v348_v37 = vpop.f32.mrb[0].mxu0  ;;  %v363_v38 = vpop.f32.mrb[0].mxu1 }
  0xf1   : > { %v349_v39 = vadd.f32 %v348_v37, %v240_v23  ;;  %v364_v40 = vadd.f32 %v363_v38, %v255_v19  ;;  %v878_v41 = vpop.f32.mrb[1].mxu0  ;;  %v887_v42 = vpop.f32.mrb[1].mxu1 }
  0xf2   : > { %v552_v23 = vpop.permute.xlu0 %551 }
  0xf3   : > { %v842_v44 = vmul.f32 -1.442695, %v349_v39  ;;  %v845_v45 = vmul.f32 -1.442695, %v364_v40 }
  0xf4   : > { %v353_v48 = vpop.f32.mrb[2].mxu0  ;;  %v368_v49 = vpop.f32.mrb[2].mxu1 }
  0xf5   : > { %973 = vpow2.f32 %v842_v44  ;;  %v354_v50 = vadd.f32 %v353_v48, %v245_v25  ;;  %v369_v51 = vadd.f32 %v368_v49, %v260_v27  ;;  %v881_v52 = vpop.f32.mrb[3].mxu0  ;;  %v890_v53 = vpop.f32.mrb[3].mxu1  ;;  %v437_v25 = vmul.f32 16.0, %v1255_v17 }
  0xf6   : > { %975 = vpow2.f32 %v845_v45  ;;  %v574_v27 = vpop.permute.xlu1 %573  ;;  %v570_v43 = vpop.permute.xlu0 %569 }
  0xf7   : > { %v860_v55 = vpack.c.bf16 %v354_v50, %v349_v39  ;;  %v843_v56 = vmul.f32 -1.442695, %v354_v50  ;;  %v856_v57 = vpack.c.bf16 %v369_v51, %v369_v51  ;;  %v846_v58 = vmul.f32 -1.442695, %v369_v51 }
  0xf8   : > { %v358_v60 = vpop.f32.mrb[4].mxu0 }
  0xf9   : > { %861 = vst [vmem:[%s1246_s6] sm:$0xff] %v860_v55   ;;  %977 = vpow2.f32 %v843_v56  ;;  %397 = vst [vmem:[%s1246_s6 + $0x10] sm:$0xf] %v856_v57  ;;  %v359_v61 = vadd.f32 %v358_v60, %v250_v18  ;;  %v884_v62 = vpop.f32.mrb[5].mxu0 }
  0xfa   : > { %979 = vpow2.f32 %v846_v58  ;;  %v578_v51 = vpop.permute.xlu1 %577 }
  0xfb   : > { %v865_v1 = vpack.c.bf16 %v364_v40, %v359_v61  ;;  %v844_v2 = vmul.f32 -1.442695, %v359_v61  ;;  %v438_v40 = vsub.f32 %v433_v0, %v437_v25  ;;  %v587_v61 = vmul.f32 %v578_v51, %v1255_v17 }
  0xfd   : > { %867 = vst [vmem:[%s1246_s6 + $0x8] sm:$0xff] %v865_v1   ;;  %981 = vpow2.f32 %v844_v2  ;;  %v554_v54 = vmul.f32 %v1242_v47, %v438_v40  ;;  %v555_v2 = vmul.f32 %v540_v12, %v438_v40 }
  0xff   : > { %v974_v5 = vpop.eup %973 }
 0x100   : > { %v976_v7 = vpop.eup %975  ;;  %v413_v8 = vadd.f32 1.0, %v974_v5 }
 0x101   : > { %v416_v9 = vadd.f32 1.0, %v976_v7 }
 0x102   : > { %983 = vrcp.f32 %v413_v8 }
 0x103   : > { %v978_v11 = vpop.eup %977  ;;  %985 = vrcp.f32 %v416_v9 }
 0x104   : > { %v980_v13 = vpop.eup %979  ;;  %v414_v14 = vadd.f32 1.0, %v978_v11 }
 0x105   : > { %v417_v15 = vadd.f32 1.0, %v980_v13  ;;  %v586_v13 = vmul.f32 %v574_v27, %v1255_v17 }
 0x106   : > { %987 = vrcp.f32 %v414_v14 }
 0x107   : > { %v982_v18 = vpop.eup %981  ;;  %989 = vrcp.f32 %v417_v15  ;;  %v633_v15 = vld [vmem:[%s1246_s6 + $0x8] sm:$0xf] (%p1128_p5) }
 0x108   : > { %v415_v19 = vadd.f32 1.0, %v982_v18  ;;  %634 = vst [vmem:[%s613_s13 + $0x10] sm:$0xf] (%p1128_p5), %v633_v15 }
 0x10a   : > { %991 = vrcp.f32 %v415_v19 }
 0x10c   : > { %v984_v35 = vpop.eup %983 }
 0x10d   : > { %v986_v37 = vpop.eup %985  ;;  %v474_v38 = vmul.f32 %v984_v35, %v984_v35  ;;  %v469_v41 = vmul.f32 %v984_v35, %v1212_v20  ;;  %v557_v20 = vmul.f32 %v548_v6, %v438_v40  ;;  %v558_v6 = vmul.f32 %v552_v23, %v438_v40 }
 0x10e   : > { %v477_v39 = vmul.f32 %v986_v37, %v986_v37  ;;  %v472_v45 = vmul.f32 %v986_v37, %v1216_v22 }
 0x10f   : > { %v499_v42 = vmul.f32 %v1218_v24, %v474_v38 }
 0x110   : > { %v988_v44 = vpop.eup %987  ;;  %v502_v46 = vmul.f32 %v1222_v28, %v477_v39  ;;  %v584_v28 = vmul.f32 %v566_v16, %v1255_v17  ;;  %v635_v16 = vld [vmem:[%s1246_s6 + $0xc] sm:$0xf] (%p1128_p5) }
 0x111   : > { %v990_v48 = vpop.eup %989  ;;  %v504_v49 = vadd.f32 %v499_v42, %v469_v41  ;;  %v475_v50 = vmul.f32 %v988_v44, %v988_v44  ;;  %v470_v22 = vmul.f32 %v988_v44, %v1224_v29  ;;  %v585_v29 = vmul.f32 %v570_v43, %v1255_v17  ;;  %636 = vst [vmem:[%s613_s13 + $0x18] sm:$0xf] (%p1128_p5), %v635_v16 }
 0x112   : > { %v507_v52 = vadd.f32 %v502_v46, %v472_v45  ;;  %v478_v53 = vmul.f32 %v990_v48, %v990_v48  ;;  %v473_v60 = vmul.f32 %v990_v48, %v1228_v31 }
 0x113   : > { %v529_v24 = vadd.f32 %v1226_v30, %v504_v49  ;;  %v500_v55 = vmul.f32 %v1232_v33, %v475_v50  ;;  %v582_v30 = vpop.permute.xlu0 %581 }
 0x114   : > { %v992_v56 = vpop.eup %991  ;;  %v532_v57 = vadd.f32 %v1234_v34, %v507_v52  ;;  %v503_v58 = vmul.f32 %v1237_v36, %v478_v53  ;;  %v588_v8 = vmul.f32 %v582_v30, %v1255_v17  ;;  %v637_v17 = vld [vmem:[%s1246_s6 + $0x10] sm:$0xf] (%p1128_p5) }
 0x115   : > { %v559_v62 = vadd.f32 %v554_v54, %v529_v24  ;;  %v505_v47 = vadd.f32 %v500_v55, %v470_v22  ;;  %v476_v0 = vmul.f32 %v992_v56, %v992_v56  ;;  %v471_v34 = vmul.f32 %v992_v56, %v1214_v21  ;;  %638 = vst [vmem:[%s613_s13 + $0x20] sm:$0xf] (%p1128_p5), %v637_v17 }
 0x116   : > { %v508_v1 = vadd.f32 %v503_v58, %v473_v60  ;;  %v562_v33 = vadd.f32 %v557_v20, %v532_v57 }
 0x117   : > { %v530_v4 = vadd.f32 %v1244_v59, %v505_v47  ;;  %v501_v36 = vmul.f32 %v1220_v26, %v476_v0  ;;  %v589_v5 = vadd.f32 %v584_v28, %v559_v62  ;;  %v556_v59 = vmul.f32 %v1250_v63, %v438_v40  ;;  %v631_v63 = vld [vmem:[%s1246_s6 + $0x4] sm:$0xf] (%p1128_p5) }
 0x118   : > { %v533_v31 = vadd.f32 %v1253_v3, %v508_v1  ;;  %v592_v7 = vadd.f32 %v587_v61, %v562_v33  ;;  %632 = vst [vmem:[%s613_s13 + $0x8] sm:$0xf] (%p1128_p5), %v631_v63 }
 0x119   : > { %v506_v9 = vadd.f32 %v501_v36, %v471_v34  ;;  %v560_v10 = vadd.f32 %v555_v2, %v530_v4  ;;  %594 = vst [vmem:[%s1282_s15] sm:$0xff] %v589_v5 }
 0x11a   : > { %v563_v21 = vadd.f32 %v558_v6, %v533_v31  ;;  %597 = vst [vmem:[%s1282_s15 + $0x18] sm:$0xff] %v592_v7 }
 0x11b   : > { %v531_v26 = vadd.f32 %v1230_v32, %v506_v9  ;;  %v590_v3 = vadd.f32 %v585_v29, %v560_v10  ;;  %609 = sbr.rel (!%p1128_p5) target bundleno = 290 (0x122), region = 36  ;;  %v629_v32 = vld [vmem:[%s1246_s6] sm:$0xf] (%p1128_p5) }
 0x11c   : > { %v593_v11 = vadd.f32 %v588_v8, %v563_v21  ;;  %630 = vst [vmem:[%s613_s13] sm:$0xf] (%p1128_p5), %v629_v32 }
 0x11d   : > { %v561_v12 = vadd.f32 %v556_v59, %v531_v26  ;;  %595 = vst [vmem:[%s1282_s15 + $0x8] sm:$0xff] %v590_v3 }
 0x11e   : > { %598 = vst [vmem:[%s1282_s15 + $0x20] sm:$0xff] %v593_v11 }
 0x11f   : > { %v591_v14 = vadd.f32 %v586_v13, %v561_v12 }
 0x121   : > { %596 = vst [vmem:[%s1282_s15 + $0x10] sm:$0xff] %v591_v14 }
 0x122 PF: > { %671 = sbr.rel (!%p1128_p5) target bundleno = 299 (0x12b), region = 77  ;;  %v711_v18 = vld [vmem:[%s1282_s15] sm:$0xff] (%p1128_p5)  ;;  %v717_v25 = vld [vmem:[%s1282_s15 + $0x18] sm:$0xff] (%p1128_p5) }
 0x123   : > { %s896_s14 = smul.u32 (%p1128_p5), 10, %s1035_s18 }
 0x124   : > { %v713_v19 = vld [vmem:[%s1282_s15 + $0x8] sm:$0xff] (%p1128_p5) }
 0x125   : > { %s673_s24 = sadd.s32 (%p1128_p5), %s1031_s17, %s896_s14  ;;  %v719_v27 = vld [vmem:[%s1282_s15 + $0x20] sm:$0xff] (%p1128_p5) }
 0x126   : > { %s849_s25 = sshll.u32 (%p1128_p5), %s673_s24, 3 }
 0x127   : > { %s675_s26 = scalar_lea.vmem (%p1128_p5), %s1341_s4, %s849_s25 }
 0x128   : > { %v715_v23 = vld [vmem:[%s1282_s15 + $0x10] sm:$0xff] (%p1128_p5)  ;;  %712 = vst [vmem:[%s675_s26] sm:$0xff] (%p1128_p5), %v711_v18  ;;  %714 = vst [vmem:[%s675_s26 + $0x10] sm:$0xff] (%p1128_p5), %v713_v19 }
 0x129   : > { %716 = vst [vmem:[%s675_s26 + $0x20] sm:$0xff] %v715_v23  ;;  %718 = vst [vmem:[%s675_s26 + $0x30] sm:$0xff] %v717_v25 }
 0x12a   : > { %720 = vst [vmem:[%s675_s26 + $0x40] sm:$0xff] %v719_v27 }
 0x12b PF: > { %s15_s21 = sadd.s32 1, %s1047_s21   ;;  %s1343_s15 = smov %s1027_s16 }
 0x12c   : > { %p12_p11 = scmp.ge.s32.totalorder %s15_s21, 6   ;;  %s1344_s16 = smov %s1139_s30 }
 0x12d   : > { %s1345_s17 = smov %s1039_s19  ;;  %s1346_s18 = smov %s1043_s20 }
 0x12e   : > { %s1347_s19 = smov %s1350_s22  ;;  %s1348_s20 = smov %s1354_s23 }
 0x12f   :  { %14 = sbr.rel (!%p12_p11) target bundleno = 4 (0x4), region = 153 }

// kernel: detect_forward.5
= control target key start
LH: loop header
LB: loop body
LE: loop exit
PB: predicated region body
PF: predicated region fallthrough
CT: control target
= control target key end

     0   :  { %s940_s15 = smov 0   ;;  %s942_s16 = smov 0   ;;  %s1121_s0 = inlined_call_operand.vmem [shape: f32[2,16,64], index: 0, kind: input, shape index: {}]   ;;  %s1122_s1 = inlined_call_operand.vmem [shape: f32[40,16], index: 1, kind: input, shape index: {}]   ;;  %s1123_s2 = inlined_call_operand.vmem [shape: f32[40,8], index: 2, kind: input, shape index: {}]   ;;  %s1124_s3 = inlined_call_operand.vmem [shape: bf16[2,40,64], index: 3, kind: output, shape index: {0}]   ;;  %s1125_s4 = inlined_call_operand.vmem [shape: f32[2,40,64], index: 4, kind: output, shape index: {1}]  }
   0x1   :  { %s944_s17 = smov 0  }
   0x2 LB: > { %s27_s18 = sadd.s32 1, %s900_s16  ;;  %p756_p0 = scmp.ge.s32.totalorder %s904_s17, 1  ;;  %s904_s17 = sphi %s944_s17, %s15_s17   ;;  %s900_s16 = sphi %s942_s16, %s1127_s16   ;;  %s896_s15 = sphi %s940_s15, %s1126_s15  }
   0x3   : > { %p29_p1 = scmp.ge.s32.totalorder %s27_s18, 2  ;;  %p186_p2 = scmp.lt.s32.totalorder %s904_s17, 3 }
   0x5   : > { %s1129_s18 = smov (%p29_p1, %s27_s18), 0  ;;  %p187_p3 = pnand %p756_p0, %p186_p2 }
   0x6   : > { %p226_p4 = scmp.lt.s32.totalorder (!%p187_p3), %s896_s15, 1  ;;  %v906_v0 = vmov (!%p187_p3), 0.0|0.0   ;;  %vm907_vm0 = vmmov (!%p187_p3), 0   ;;  %v908_v1 = vmov (!%p187_p3), 0.0   ;;  %v965_v2 = vld [vmem:[%s1123_s2 + $0x10] sm:$0xff] (!%p187_p3)  ;;  %v909_v3 = vmov (!%p187_p3), 0  }
   0x7   : > { %190 = sbr.rel (%p187_p3) target bundleno = 284 (0x11c), region = 32  ;;  %810 = vmatprep.subr.bf16.mxu0 (!%p187_p3), %v906_v0  ;;  %813 = vmatprep.subr.bf16.mxu1 (!%p187_p3), %v906_v0  ;;  %v970_v4 = vld [vmem:[%s1123_s2] sm:$0xff] (!%p187_p3)  ;;  %v981_v5 = vld [vmem:[%s1123_s2 + $0x18] sm:$0xff] (!%p187_p3)  ;;  %v258_v6 = vld [vmem:[%s1123_s2 + $0x8] sm:$0xff] (!%p187_p3)  ;;  %vm287_vm1 = vcmask (!%p187_p3), 130048   ;;  %v910_v15 = vmov (!%p187_p3), 1   ;;  %v451_v45 = vlaneseq (!%p187_p3) }
   0x8   : > { %795 = vmatprep.mubr.msk.f32.mxu0 (!%p187_p3), %vm907_vm0, %v908_v1  ;;  %804 = vmatprep.mubr.msk.f32.mxu1 (!%p187_p3), %vm907_vm0, %v908_v1  ;;  %v250_v10 = vld [vmem:[%s1122_s1] sm:$0xff] (!%p187_p3)  ;;  %v253_v11 = vld [vmem:[%s1122_s1 + $0x18] sm:$0xff] (!%p187_p3)  ;;  %v251_v13 = vld [vmem:[%s1122_s1 + $0x8] sm:$0xff] (!%p187_p3)  ;;  %v911_v17 = vmov (!%p187_p3), 2   ;;  %v912_v18 = vmov (!%p187_p3), 3   ;;  %v913_v19 = vmov (!%p187_p3), 4  }
   0x9   : > { %851 = vset.pattern.permute.xlu1 (!%p187_p3), %v909_v3  ;;  %850 = vset.pattern.permute.xlu0 (!%p187_p3), %v909_v3  ;;  %v261_v12 = vld [vmem:[%s1123_s2 + $0x20] sm:$0xff] (!%p187_p3)  ;;  %v252_v16 = vld [vmem:[%s1122_s1 + $0x10] sm:$0xff] (!%p187_p3)  ;;  %v914_v20 = vmov (!%p187_p3), 5   ;;  %vm414_vm2 = vcmask (!%p187_p3), 519168   ;;  %v452_v57 = vand.u32 (!%p187_p3), 127, %v451_v45  ;;  %vm616_vm3 = vcmask (!%p187_p3), 523264  }
   0xa   : > { %274 = vperm.xlu1 (!%p187_p3), %851, %v965_v2   ;;  %264 = vperm.xlu0 (!%p187_p3), %850, %v970_v4   ;;  %v254_v14 = vld [vmem:[%s1122_s1 + $0x20] sm:$0xff] (!%p187_p3) }
   0xb   : > { %v455_v3 = vcvt.s32.f32 (!%p187_p3), %v452_v57 }
   0xe   : > { %s1131_s15 = smov (!%p226_p4, %s896_s15), 1  ;;  %279 = vperm.xlu1 %851, %v981_v5   ;;  %269 = vperm.xlu0 %850, %v258_v6  }
   0xf   : > { %s778_s23 = sshll.u32 %s1131_s15, 4  ;;  %s815_s21 = smul.u32 20, %s1131_s15 }
  0x10   : > { %s233_s26 = scalar_lea.vmem %s1121_s0, %s778_s23  ;;  %s816_s25 = smul.u32 40, %s1131_s15 }
  0x11   : > { %v255_v7 = vld [vmem:[%s233_s26] sm:$0xff]  ;;  %v256_v8 = vld [vmem:[%s233_s26 + $0x8] sm:$0xff]  ;;  %s1058_s24 = scalar_lea.vmem %s1124_s3, %s815_s21 }
  0x12   : > { %v811_v9 = vpack.c.bf16 %v256_v8, %v255_v7  ;;  %852 = vset.pattern.permute.xlu1 %v910_v15  ;;  %284 = vperm.xlu0 %850, %v261_v12   ;;  %v456_v7 = vadd.f32 0.5, %v455_v3  ;;  %s249_s27 = scalar_lea.vmem %s1125_s4, %s816_s25 }
  0x13   : > { %468 = vperm.xlu1 %852, %v970_v4  }
  0x14   : > { %812 = vmatpush3.bf16.msra.mxu0 %v811_v9  ;;  %814 = vmatpush3.bf16.msra.mxu1 %v811_v9 }
  0x16   : > { %853 = vset.pattern.permute.xlu0 %v910_v15 }
  0x17   : > { %796 = vmatmul.mubr.msk.f32.vlgmr.msra.gmra.mrb[0].mxu0 %vm287_vm1, %v250_v10  ;;  %805 = vmatmul.mubr.msk.f32.vlgmr.msra.gmra.mrb[0].mxu1 %vm287_vm1, %v253_v11 }
  0x18   : > { %798 = vmatprep.mubr.msk.f32.mxu0 %vm907_vm0, %v908_v1  ;;  %807 = vmatprep.mubr.msk.f32.mxu1 %vm907_vm0, %v908_v1 }
  0x19   : > { %478 = vperm.xlu1 %852, %v965_v2   ;;  %473 = vperm.xlu0 %853, %v258_v6  }
  0x1b   : > { %799 = vmatmul.mubr.msk.f32.gmra.mrb[2].mxu0 %vm287_vm1, %v251_v13  ;;  %808 = vmatmul.mubr.msk.f32.gmra.mrb[2].mxu1 %vm287_vm1, %v254_v14  ;;  %v457_v13 = vmul.f32 0.125, %v456_v7 }
  0x1c   : > { %801 = vmatprep.mubr.msk.f32.mxu0 %vm907_vm0, %v908_v1 }
  0x1d   : > { %483 = vperm.xlu1 %852, %v981_v5   ;;  %488 = vperm.xlu0 %853, %v261_v12  }
  0x1f   : > { %802 = vmatmul.mubr.msk.f32.gmra.mrb[4].mxu0 %vm287_vm1, %v252_v16 }
  0x21   : > { %854 = vset.pattern.permute.xlu1 %v911_v17  ;;  %855 = vset.pattern.permute.xlu0 %v911_v17 }
  0x22   : > { %502 = vperm.xlu1 %854, %v970_v4   ;;  %506 = vperm.xlu0 %855, %v258_v6  }
  0x26   : > { %510 = vperm.xlu1 %854, %v965_v2   ;;  %518 = vperm.xlu0 %855, %v261_v12  }
  0x2a   : > { %514 = vperm.xlu1 %854, %v981_v5   ;;  %857 = vset.pattern.permute.xlu0 %v912_v18 }
  0x2b   : > { %536 = vperm.xlu0 %857, %v258_v6  }
  0x2e   : > { %856 = vset.pattern.permute.xlu1 %v912_v18 }
  0x2f   : > { %532 = vperm.xlu1 %856, %v970_v4   ;;  %548 = vperm.xlu0 %857, %v261_v12  }
  0x33   : > { %540 = vperm.xlu1 %856, %v965_v2   ;;  %859 = vset.pattern.permute.xlu0 %v913_v19 }
  0x34   : > { %561 = vperm.xlu0 %859, %v258_v6  }
  0x37   : > { %544 = vperm.xlu1 %856, %v981_v5  }
  0x38   : > { %573 = vperm.xlu0 %859, %v261_v12  }
  0x3b   : > { %858 = vset.pattern.permute.xlu1 %v913_v19 }
  0x3c   : > { %557 = vperm.xlu1 %858, %v970_v4   ;;  %861 = vset.pattern.permute.xlu0 %v914_v20 }
  0x3d   : > { %591 = vperm.xlu0 %861, %v258_v6  }
  0x40   : > { %565 = vperm.xlu1 %858, %v965_v2  }
  0x41   : > { %603 = vperm.xlu0 %861, %v261_v12  }
  0x44   : > { %569 = vperm.xlu1 %858, %v981_v5  }
  0x48   : > { %860 = vset.pattern.permute.xlu1 %v914_v20  ;;  %v1078_v20 = vfloor.f32 %v457_v13 }
  0x49   : > { %587 = vperm.xlu1 %860, %v970_v4  }
  0x4d   : > { %595 = vperm.xlu1 %860, %v965_v2  }
  0x51   : > { %599 = vperm.xlu1 %860, %v981_v5  }
  0x89   : > { %v275_v21 = vpop.permute.xlu1 %274  ;;  %v265_v26 = vpop.permute.xlu0 %264 }
  0x8d   : > { %v280_v22 = vpop.permute.xlu1 %279  ;;  %v270_v28 = vpop.permute.xlu0 %269 }
  0x91   : > { %v285_v30 = vpop.permute.xlu0 %284 }
  0x92   : > { %v1028_v23 = vpop.permute.xlu1 %468 }
  0x98   : > { %v1030_v24 = vpop.permute.xlu1 %478  ;;  %v1040_v32 = vpop.permute.xlu0 %473 }
  0x9c   : > { %v1032_v25 = vpop.permute.xlu1 %483  ;;  %v1044_v34 = vpop.permute.xlu0 %488 }
  0xa1   : > { %v1034_v27 = vpop.permute.xlu1 %502  ;;  %v1048_v36 = vpop.permute.xlu0 %506 }
  0xa5   : > { %v1036_v29 = vpop.permute.xlu1 %510  ;;  %v1053_v38 = vpop.permute.xlu0 %518 }
  0xa9   : > { %v1038_v31 = vpop.permute.xlu1 %514 }
  0xaa   : > { %v1066_v62 = vpop.permute.xlu0 %536 }
  0xae   : > { %v1042_v33 = vpop.permute.xlu1 %532  ;;  %v1076_v6 = vpop.permute.xlu0 %548 }
  0xb2   : > { %v1046_v35 = vpop.permute.xlu1 %540 }
  0xb3   : > { %v562_v15 = vpop.permute.xlu0 %561 }
  0xb6   : > { %v1050_v37 = vpop.permute.xlu1 %544 }
  0xbb   : > { %v1060_v50 = vpop.permute.xlu1 %557 }
  0xbf   : > { %v1072_v2 = vpop.permute.xlu1 %565 }
  0xc3   : > { %v570_v9 = vpop.permute.xlu1 %569 }
  0xc8   : > { %v588_v19 = vpop.permute.xlu1 %587 }
  0xea   : > { %v369_v39 = vpop.f32.mrb[0].mxu0  ;;  %v384_v40 = vpop.f32.mrb[0].mxu1 }
  0xeb   : > { %v370_v41 = vadd.f32 %v369_v39, %v265_v26  ;;  %v385_v42 = vadd.f32 %v384_v40, %v280_v22  ;;  %v797_v43 = vpop.f32.mrb[1].mxu0  ;;  %v806_v44 = vpop.f32.mrb[1].mxu1 }
  0xec   : > { %v574_v26 = vpop.permute.xlu0 %573 }
  0xed   : > { %v779_v46 = vpack.c.bf16 %v370_v41, %v370_v41  ;;  %v771_v47 = vmul.f32 -1.442695, %v370_v41  ;;  %v782_v48 = vpack.c.bf16 %v385_v42, %v385_v42  ;;  %v774_v49 = vmul.f32 -1.442695, %v385_v42 }
  0xee   : > { %v374_v51 = vpop.f32.mrb[2].mxu0  ;;  %v389_v52 = vpop.f32.mrb[2].mxu1 }
  0xef   : > { %415 = vst.msk [vmem:[%s1058_s24] sm:$0xf] %vm414_vm2, %v779_v46  ;;  %862 = vpow2.f32 %v771_v47  ;;  %418 = vst.msk [vmem:[%s1058_s24 + $0xc] sm:$0xf] %vm414_vm2, %v782_v48  ;;  %v375_v53 = vadd.f32 %v374_v51, %v270_v28  ;;  %v390_v54 = vadd.f32 %v389_v52, %v285_v30  ;;  %v800_v55 = vpop.f32.mrb[3].mxu0  ;;  %v809_v56 = vpop.f32.mrb[3].mxu1 }
  0xf0   : > { %864 = vpow2.f32 %v774_v49  ;;  %v459_v28 = vmul.f32 8.0, %v1078_v20  ;;  %v596_v30 = vpop.permute.xlu1 %595  ;;  %v592_v46 = vpop.permute.xlu0 %591 }
  0xf1   : > { %v780_v58 = vpack.c.bf16 %v375_v53, %v375_v53  ;;  %v772_v59 = vmul.f32 -1.442695, %v375_v53  ;;  %v783_v60 = vpack.c.bf16 %v390_v54, %v390_v54  ;;  %v775_v61 = vmul.f32 -1.442695, %v390_v54 }
  0xf2   : > { %v379_v63 = vpop.f32.mrb[4].mxu0  ;;  %v460_v43 = vsub.f32 %v455_v3, %v459_v28 }
  0xf3   : > { %416 = vst.msk [vmem:[%s1058_s24 + $0x4] sm:$0xf] %vm414_vm2, %v780_v58  ;;  %866 = vpow2.f32 %v772_v59  ;;  %419 = vst.msk [vmem:[%s1058_s24 + $0x10] sm:$0xf] %vm414_vm2, %v783_v60  ;;  %v380_v0 = vadd.f32 %v379_v63, %v275_v21  ;;  %v803_v1 = vpop.f32.mrb[5].mxu0 }
  0xf4   : > { %868 = vpow2.f32 %v775_v61  ;;  %v600_v54 = vpop.permute.xlu1 %599  ;;  %v576_v57 = vmul.f32 %v1060_v50, %v460_v43  ;;  %v579_v58 = vmul.f32 %v570_v9, %v460_v43  ;;  %v580_v9 = vmul.f32 %v574_v26, %v460_v43 }
  0xf5   : > { %v781_v4 = vpack.c.bf16 %v380_v0, %v380_v0  ;;  %v773_v5 = vmul.f32 -1.442695, %v380_v0  ;;  %v609_v0 = vmul.f32 %v600_v54, %v1078_v20 }
  0xf7   : > { %417 = vst.msk [vmem:[%s1058_s24 + $0x8] sm:$0xf] %vm414_vm2, %v781_v4  ;;  %870 = vpow2.f32 %v773_v5  ;;  %v577_v5 = vmul.f32 %v562_v15, %v460_v43 }
  0xf9   : > { %v863_v8 = vpop.eup %862 }
  0xfa   : > { %v865_v10 = vpop.eup %864  ;;  %v435_v11 = vadd.f32 1.0, %v863_v8 }
  0xfb   : > { %v438_v12 = vadd.f32 1.0, %v865_v10 }
  0xfc   : > { %872 = vrcp.f32 %v435_v11 }
  0xfd   : > { %v867_v14 = vpop.eup %866  ;;  %874 = vrcp.f32 %v438_v12 }
  0xfe   : > { %v869_v16 = vpop.eup %868  ;;  %v436_v17 = vadd.f32 1.0, %v867_v14 }
  0xff   : > { %v439_v18 = vadd.f32 1.0, %v869_v16 }
 0x100   : > { %876 = vrcp.f32 %v436_v17 }
 0x101   : > { %v871_v21 = vpop.eup %870  ;;  %878 = vrcp.f32 %v439_v18 }
 0x102   : > { %v437_v22 = vadd.f32 1.0, %v871_v21 }
 0x104   : > { %880 = vrcp.f32 %v437_v22 }
 0x106   : > { %v873_v39 = vpop.eup %872 }
 0x107   : > { %v875_v40 = vpop.eup %874  ;;  %v496_v41 = vmul.f32 %v873_v39, %v873_v39  ;;  %v491_v44 = vmul.f32 %v873_v39, %v1028_v23 }
 0x108   : > { %v499_v42 = vmul.f32 %v875_v40, %v875_v40  ;;  %v494_v48 = vmul.f32 %v875_v40, %v1032_v25  ;;  %v606_v25 = vmul.f32 %v588_v19, %v1078_v20 }
 0x109   : > { %v521_v45 = vmul.f32 %v1034_v27, %v496_v41 }
 0x10a   : > { %v877_v47 = vpop.eup %876  ;;  %v524_v49 = vmul.f32 %v1038_v31, %v499_v42 }
 0x10b   : > { %v879_v51 = vpop.eup %878  ;;  %v526_v52 = vadd.f32 %v521_v45, %v491_v44  ;;  %v497_v53 = vmul.f32 %v877_v47, %v877_v47  ;;  %v492_v59 = vmul.f32 %v877_v47, %v1040_v32  ;;  %v607_v32 = vmul.f32 %v592_v46, %v1078_v20 }
 0x10c   : > { %v529_v55 = vadd.f32 %v524_v49, %v494_v48  ;;  %v500_v56 = vmul.f32 %v879_v51, %v879_v51  ;;  %v495_v63 = vmul.f32 %v879_v51, %v1044_v34 }
 0x10d   : > { %v551_v23 = vadd.f32 %v1042_v33, %v526_v52  ;;  %v522_v27 = vmul.f32 %v1048_v36, %v497_v53  ;;  %v604_v33 = vpop.permute.xlu0 %603 }
 0x10e   : > { %v881_v60 = vpop.eup %880  ;;  %v554_v31 = vadd.f32 %v1050_v37, %v529_v55  ;;  %v525_v61 = vmul.f32 %v1053_v38, %v500_v56  ;;  %v610_v11 = vmul.f32 %v604_v33, %v1078_v20 }
 0x10f   : > { %v581_v1 = vadd.f32 %v576_v57, %v551_v23  ;;  %v527_v50 = vadd.f32 %v522_v27, %v492_v59  ;;  %v498_v3 = vmul.f32 %v881_v60, %v881_v60  ;;  %v493_v34 = vmul.f32 %v881_v60, %v1030_v24 }
 0x110   : > { %v530_v4 = vadd.f32 %v525_v61, %v495_v63  ;;  %v584_v36 = vadd.f32 %v579_v58, %v554_v31  ;;  %v578_v24 = vmul.f32 %v1072_v2, %v460_v43 }
 0x111   : > { %v552_v37 = vadd.f32 %v1066_v62, %v527_v50  ;;  %v523_v38 = vmul.f32 %v1036_v29, %v498_v3  ;;  %v611_v7 = vadd.f32 %v606_v25, %v581_v1 }
 0x112   : > { %v555_v8 = vadd.f32 %v1076_v6, %v530_v4  ;;  %v614_v10 = vadd.f32 %v609_v0, %v584_v36  ;;  %v608_v6 = vmul.f32 %v596_v30, %v1078_v20 }
 0x113   : > { %v528_v12 = vadd.f32 %v523_v38, %v493_v34  ;;  %v582_v13 = vadd.f32 %v577_v5, %v552_v37  ;;  %617 = vst.msk [vmem:[%s249_s27] sm:$0xff] %vm616_vm3, %v611_v7 }
 0x114   : > { %v585_v14 = vadd.f32 %v580_v9, %v555_v8  ;;  %620 = vst.msk [vmem:[%s249_s27 + $0x18] sm:$0xff] %vm616_vm3, %v614_v10 }
 0x115   : > { %v553_v62 = vadd.f32 %v1046_v35, %v528_v12  ;;  %v612_v15 = vadd.f32 %v607_v32, %v582_v13 }
 0x116   : > { %v615_v29 = vadd.f32 %v610_v11, %v585_v14 }
 0x117   : > { %v583_v16 = vadd.f32 %v578_v24, %v553_v62  ;;  %618 = vst.msk [vmem:[%s249_s27 + $0x8] sm:$0xff] %vm616_vm3, %v612_v15 }
 0x118   : > { %621 = vst.msk [vmem:[%s249_s27 + $0x20] sm:$0xff] %vm616_vm3, %v615_v29 }
 0x119   : > { %v613_v17 = vadd.f32 %v608_v6, %v583_v16 }
 0x11b   : > { %619 = vst.msk [vmem:[%s249_s27 + $0x10] sm:$0xff] %vm616_vm3, %v613_v17 }
 0x11c PF: > { %s15_s17 = sadd.s32 1, %s904_s17   ;;  %s1126_s15 = smov %s900_s16 }
 0x11d   : > { %p12_p5 = scmp.ge.s32.totalorder %s15_s17, 4   ;;  %s1127_s16 = smov %s1129_s18 }
 0x11f   :  { %14 = sbr.rel (!%p12_p5) target bundleno = 2 (0x2), region = 74 }

</bundles_post_ra>
